<compile_context>
chip_gen: v7x
topology: tpu7x:2x2x1
jax: 0.10.0
libtpu: 0.0.40
codegen_flags: <defaults>
</compile_context>

<pallas_src>
import jax
import jax.numpy as jnp
from jax.experimental import pallas as pl
from jax.experimental.pallas import tpu as pltpu

NUM_FEATURES = 784
NUM_HIDDEN_1 = 128
NUM_HIDDEN_2 = 256
NUM_CLASSES = 10

FEAT_PAD = 896        # 7 * 128 — lane-aligned feature dim
CLASS_PAD = 128       # lane-dense class dim
BATCH_TILE = 128      # fills MXU M rows on v5e/v6e; fine on v7x too
NEG_PAD_BIAS = -1e30  # padded class lanes -> exp() == 0 in log-softmax


def ff_nn_kernel(x_ref, w1_ref, b1_ref, w2_ref, b2_ref, w3_ref, b3_ref,
                 logits_ref, logprobs_ref):
    x = x_ref[...]                                               # (TB, 896) bf16

    # linear_1 + relu (f32 accumulate, f32 epilogue)
    h1 = jnp.dot(x, w1_ref[...], preferred_element_type=jnp.float32) + b1_ref[...]
    h1 = jnp.maximum(h1, 0.0).astype(jnp.bfloat16)               # (TB, 128)

    # linear_2 + relu
    h2 = jnp.dot(h1, w2_ref[...], preferred_element_type=jnp.float32) + b2_ref[...]
    h2 = jnp.maximum(h2, 0.0).astype(jnp.bfloat16)               # (TB, 256)

    # linear_out (padded to 128 classes; padded lanes carry -1e30 bias)
    logits = jnp.dot(h2, w3_ref[...], preferred_element_type=jnp.float32) + b3_ref[...]
    logits_ref[...] = logits                                     # (TB, 128)

    # log_softmax over class dim, numerically stable; padded lanes contribute 0
    m = jnp.max(logits, axis=1, keepdims=True)
    shifted = logits - m
    lse = jnp.log(jnp.sum(jnp.exp(shifted), axis=1, keepdims=True))
    logprobs_ref[...] = shifted - lse


def ff_nn_forward(x, params):
    w1, b1, w2, b2, w3, b3 = params
    B = x.shape[0]

    # --- pad batch to a multiple of BATCH_TILE, features to FEAT_PAD ---
    n_tiles = pl.cdiv(B, BATCH_TILE)
    B_pad = n_tiles * BATCH_TILE
    x_p = jnp.pad(x, ((0, B_pad - B), (0, FEAT_PAD - NUM_FEATURES)))
    x_p = x_p.astype(jnp.bfloat16)

    # --- weights: bf16 for the MXU; pad w1 rows and w3 cols to lane multiples ---
    w1_p = jnp.pad(w1, ((0, FEAT_PAD - NUM_FEATURES), (0, 0))).astype(jnp.bfloat16)
    w2_p = w2.astype(jnp.bfloat16)
    w3_p = jnp.pad(w3, ((0, 0), (0, CLASS_PAD - NUM_CLASSES))).astype(jnp.bfloat16)

    # --- biases stay f32; padded class lanes get a huge negative bias ---
    b1_p = b1.astype(jnp.float32)
    b2_p = b2.astype(jnp.float32)
    b3_p = jnp.pad(b3.astype(jnp.float32),
                   ((0, 0), (0, CLASS_PAD - NUM_CLASSES)),
                   constant_values=NEG_PAD_BIAS)

    resident = lambda shape: pl.BlockSpec(shape, lambda i: tuple(0 for _ in shape))

    out_shapes = (
        jax.ShapeDtypeStruct((B_pad, CLASS_PAD), jnp.float32),
        jax.ShapeDtypeStruct((B_pad, CLASS_PAD), jnp.float32),
    )

    logits_p, logprobs_p = pl.pallas_call(
        ff_nn_kernel,
        out_shape=out_shapes,
        grid_spec=pltpu.PrefetchScalarGridSpec(
            num_scalar_prefetch=0,
            grid=(n_tiles,),
            in_specs=[
                pl.BlockSpec((BATCH_TILE, FEAT_PAD), lambda i: (i, 0)),  # x tile
                resident(w1_p.shape), resident(b1_p.shape),
                resident(w2_p.shape), resident(b2_p.shape),
                resident(w3_p.shape), resident(b3_p.shape),
            ],
            out_specs=[
                pl.BlockSpec((BATCH_TILE, CLASS_PAD), lambda i: (i, 0)),
                pl.BlockSpec((BATCH_TILE, CLASS_PAD), lambda i: (i, 0)),
            ],
        ),
        compiler_params=pltpu.CompilerParams(
            dimension_semantics=("parallel",)),
    )(x_p, w1_p, b1_p, w2_p, b2_p, w3_p, b3_p)

    # strip batch and class padding
    return logits_p[:B, :NUM_CLASSES], logprobs_p[:B, :NUM_CLASSES]


def init_params(key):
    """Deterministic init mimicking PyTorch Linear default (uniform +/- 1/sqrt(fan_in))."""
    def linear(key, fan_in, fan_out):
        kw, kb = jax.random.split(key)
        bound = 1.0 / jnp.sqrt(fan_in)
        w = jax.random.uniform(kw, (fan_in, fan_out), jnp.float32, -bound, bound)
        b = jax.random.uniform(kb, (1, fan_out), jnp.float32, -bound, bound)
        return w, b

    k1, k2, k3 = jax.random.split(key, 3)
    w1, b1 = linear(k1, NUM_FEATURES, NUM_HIDDEN_1)
    w2, b2 = linear(k2, NUM_HIDDEN_1, NUM_HIDDEN_2)
    w3, b3 = linear(k3, NUM_HIDDEN_2, NUM_CLASSES)
    return (w1, b1, w2, b2, w3, b3)


def reference_forward(x, params):
    """Pure-JAX f32 reference matching the PyTorch module semantics."""
    w1, b1, w2, b2, w3, b3 = params
    h1 = jnp.maximum(x @ w1 + b1, 0.0)
    h2 = jnp.maximum(h1 @ w2 + b2, 0.0)
    logits = h2 @ w3 + b3
    logprobs = jax.nn.log_softmax(logits, axis=1)
    return logits, logprobs


if __name__ == "__main__":
    key = jax.random.PRNGKey(0)
    kx, kp = jax.random.split(key)

    batch = 8
    x = jax.random.normal(kx, (batch, NUM_FEATURES), dtype=jnp.float32)
    params = init_params(kp)

    logits, logprobs = ff_nn_forward(x, params)
    jax.block_until_ready((logits, logprobs))

    ref_logits, ref_logprobs = reference_forward(x, params)
    # kernel uses bf16 MXU inputs with f32 accumulation -> modest tolerance vs f32 ref
    assert logits.shape == (batch, NUM_CLASSES)
    assert logprobs.shape == (batch, NUM_CLASSES)
    assert jnp.allclose(logits, ref_logits, atol=5e-2, rtol=5e-2)
    assert jnp.allclose(logprobs, ref_logprobs, atol=5e-2, rtol=5e-2)

    print("KERNEL_OK")
</pallas_src>

<mosaic_0001>
module attributes {stable_mosaic.version = 11 : i64} {
  func.func @ff_nn_kernel(%arg0: i32, %arg1: memref<128x896xbf16, #tpu.memory_space<vmem>>, %arg2: memref<896x128xbf16, #tpu.memory_space<vmem>>, %arg3: memref<1x128xf32, #tpu.memory_space<vmem>>, %arg4: memref<128x256xbf16, #tpu.memory_space<vmem>>, %arg5: memref<1x256xf32, #tpu.memory_space<vmem>>, %arg6: memref<256x128xbf16, #tpu.memory_space<vmem>>, %arg7: memref<1x128xf32, #tpu.memory_space<vmem>>, %arg8: memref<128x128xf32, #tpu.memory_space<vmem>>, %arg9: memref<128x128xf32, #tpu.memory_space<vmem>>) attributes {dimension_semantics = [#tpu.dimension_semantics<parallel>], iteration_bounds = array<i64: 1>, scalar_prefetch = 0 : i64, scratch_operands = 0 : i64, tpu.core_type = #tpu.core_type<tc>, window_params = [{transform_indices = @transform_0, window_bounds = array<i64: 128, 896>}, {pipeline_mode = #tpu.pipeline_mode<synchronous>, transform_indices = @transform_1, window_bounds = array<i64: 896, 128>}, {pipeline_mode = #tpu.pipeline_mode<synchronous>, transform_indices = @transform_2, window_bounds = array<i64: 1, 128>}, {pipeline_mode = #tpu.pipeline_mode<synchronous>, transform_indices = @transform_3, window_bounds = array<i64: 128, 256>}, {pipeline_mode = #tpu.pipeline_mode<synchronous>, transform_indices = @transform_4, window_bounds = array<i64: 1, 256>}, {pipeline_mode = #tpu.pipeline_mode<synchronous>, transform_indices = @transform_5, window_bounds = array<i64: 256, 128>}, {pipeline_mode = #tpu.pipeline_mode<synchronous>, transform_indices = @transform_6, window_bounds = array<i64: 1, 128>}, {transform_indices = @transform_7, window_bounds = array<i64: 128, 128>}, {transform_indices = @transform_8, window_bounds = array<i64: 128, 128>}]} {
    %c0 = arith.constant 0 : index
    %c0_0 = arith.constant 0 : index
    %0 = vector.load %arg1[%c0, %c0_0] : memref<128x896xbf16, #tpu.memory_space<vmem>>, vector<128x896xbf16>
    %c0_1 = arith.constant 0 : index
    %c0_2 = arith.constant 0 : index
    %1 = vector.load %arg2[%c0_1, %c0_2] : memref<896x128xbf16, #tpu.memory_space<vmem>>, vector<896x128xbf16>
    %cst = arith.constant dense<0.000000e+00> : vector<128x128xf32>
    %2 = tpu.matmul %0, %1, %cst {dimension_numbers = #tpu.dot_dimension_numbers<[1], [0], [0], [1], [0, 0, 1, 1], [], []>} : vector<128x896xbf16>, vector<896x128xbf16>, vector<128x128xf32> -> vector<128x128xf32>
    %c0_3 = arith.constant 0 : index
    %c0_4 = arith.constant 0 : index
    %3 = vector.load %arg3[%c0_3, %c0_4] : memref<1x128xf32, #tpu.memory_space<vmem>>, vector<1x128xf32>
    %4 = vector.broadcast %3 : vector<1x128xf32> to vector<128x128xf32>
    %5 = arith.addf %2, %4 : vector<128x128xf32>
    %cst_5 = arith.constant 0.000000e+00 : f32
    %6 = vector.broadcast %cst_5 : f32 to vector<128x128xf32>
    %7 = arith.maximumf %5, %6 : vector<128x128xf32>
    %8 = arith.truncf %7 : vector<128x128xf32> to vector<128x128xbf16>
    %c0_6 = arith.constant 0 : index
    %c0_7 = arith.constant 0 : index
    %9 = vector.load %arg4[%c0_6, %c0_7] : memref<128x256xbf16, #tpu.memory_space<vmem>>, vector<128x256xbf16>
    %cst_8 = arith.constant dense<0.000000e+00> : vector<128x256xf32>
    %10 = tpu.matmul %8, %9, %cst_8 {dimension_numbers = #tpu.dot_dimension_numbers<[1], [0], [0], [1], [0, 0, 1, 1], [], []>} : vector<128x128xbf16>, vector<128x256xbf16>, vector<128x256xf32> -> vector<128x256xf32>
    %c0_9 = arith.constant 0 : index
    %c0_10 = arith.constant 0 : index
    %11 = vector.load %arg5[%c0_9, %c0_10] : memref<1x256xf32, #tpu.memory_space<vmem>>, vector<1x256xf32>
    %12 = vector.broadcast %11 : vector<1x256xf32> to vector<128x256xf32>
    %13 = arith.addf %10, %12 : vector<128x256xf32>
    %cst_11 = arith.constant 0.000000e+00 : f32
    %14 = vector.broadcast %cst_11 : f32 to vector<128x256xf32>
    %15 = arith.maximumf %13, %14 : vector<128x256xf32>
    %16 = arith.truncf %15 : vector<128x256xf32> to vector<128x256xbf16>
    %c0_12 = arith.constant 0 : index
    %c0_13 = arith.constant 0 : index
    %17 = vector.load %arg6[%c0_12, %c0_13] : memref<256x128xbf16, #tpu.memory_space<vmem>>, vector<256x128xbf16>
    %cst_14 = arith.constant dense<0.000000e+00> : vector<128x128xf32>
    %18 = tpu.matmul %16, %17, %cst_14 {dimension_numbers = #tpu.dot_dimension_numbers<[1], [0], [0], [1], [0, 0, 1, 1], [], []>} : vector<128x256xbf16>, vector<256x128xbf16>, vector<128x128xf32> -> vector<128x128xf32>
    %c0_15 = arith.constant 0 : index
    %c0_16 = arith.constant 0 : index
    %19 = vector.load %arg7[%c0_15, %c0_16] : memref<1x128xf32, #tpu.memory_space<vmem>>, vector<1x128xf32>
    %20 = vector.broadcast %19 : vector<1x128xf32> to vector<128x128xf32>
    %21 = arith.addf %18, %20 : vector<128x128xf32>
    %c0_17 = arith.constant 0 : index
    %c0_18 = arith.constant 0 : index
    %22 = vector.load %arg8[%c0_17, %c0_18] : memref<128x128xf32, #tpu.memory_space<vmem>>, vector<128x128xf32>
    tpu.vector_store %arg8[%c0_17, %c0_18], %21 {strides = array<i32>} : memref<128x128xf32, #tpu.memory_space<vmem>>, vector<128x128xf32>,
    %cst_19 = arith.constant dense<0xFF800000> : vector<128xf32>
    %23 = vector.multi_reduction <maximumf>, %21, %cst_19 [1] : vector<128x128xf32> to vector<128xf32>
    %24 = vector.shape_cast %23 : vector<128xf32> to vector<128x1xf32>
    %25 = vector.broadcast %24 : vector<128x1xf32> to vector<128x128xf32>
    %26 = arith.subf %21, %25 : vector<128x128xf32>
    %27 = math.exp %26 : vector<128x128xf32>
    %cst_20 = arith.constant dense<0.000000e+00> : vector<128xf32>
    %28 = vector.multi_reduction <add>, %27, %cst_20 [1] : vector<128x128xf32> to vector<128xf32>
    %29 = vector.shape_cast %28 : vector<128xf32> to vector<128x1xf32>
    %30 = math.log %29 : vector<128x1xf32>
    %31 = vector.broadcast %30 : vector<128x1xf32> to vector<128x128xf32>
    %32 = arith.subf %26, %31 : vector<128x128xf32>
    %c0_21 = arith.constant 0 : index
    %c0_22 = arith.constant 0 : index
    %33 = vector.load %arg9[%c0_21, %c0_22] : memref<128x128xf32, #tpu.memory_space<vmem>>, vector<128x128xf32>
    tpu.vector_store %arg9[%c0_21, %c0_22], %32 {strides = array<i32>} : memref<128x128xf32, #tpu.memory_space<vmem>>, vector<128x128xf32>,
    return
  }
  func.func @transform_0(%arg0: i32) -> (i32, i32) {
    %c0_i32 = arith.constant 0 : i32
    %c0_i32_0 = arith.constant 0 : i32
    return %arg0, %c0_i32 : i32, i32
  }
  func.func @transform_1(%arg0: i32) -> (i32, i32) {
    %c0_i32 = arith.constant 0 : i32
    %c0_i32_0 = arith.constant 0 : i32
    %c0_i32_1 = arith.constant 0 : i32
    return %c0_i32, %c0_i32_0 : i32, i32
  }
  func.func @transform_2(%arg0: i32) -> (i32, i32) {
    %c0_i32 = arith.constant 0 : i32
    %c0_i32_0 = arith.constant 0 : i32
    %c0_i32_1 = arith.constant 0 : i32
    return %c0_i32, %c0_i32_0 : i32, i32
  }
  func.func @transform_3(%arg0: i32) -> (i32, i32) {
    %c0_i32 = arith.constant 0 : i32
    %c0_i32_0 = arith.constant 0 : i32
    %c0_i32_1 = arith.constant 0 : i32
    return %c0_i32, %c0_i32_0 : i32, i32
  }
  func.func @transform_4(%arg0: i32) -> (i32, i32) {
    %c0_i32 = arith.constant 0 : i32
    %c0_i32_0 = arith.constant 0 : i32
    %c0_i32_1 = arith.constant 0 : i32
    return %c0_i32, %c0_i32_0 : i32, i32
  }
  func.func @transform_5(%arg0: i32) -> (i32, i32) {
    %c0_i32 = arith.constant 0 : i32
    %c0_i32_0 = arith.constant 0 : i32
    %c0_i32_1 = arith.constant 0 : i32
    return %c0_i32, %c0_i32_0 : i32, i32
  }
  func.func @transform_6(%arg0: i32) -> (i32, i32) {
    %c0_i32 = arith.constant 0 : i32
    %c0_i32_0 = arith.constant 0 : i32
    %c0_i32_1 = arith.constant 0 : i32
    return %c0_i32, %c0_i32_0 : i32, i32
  }
  func.func @transform_7(%arg0: i32) -> (i32, i32) {
    %c0_i32 = arith.constant 0 : i32
    %c0_i32_0 = arith.constant 0 : i32
    return %arg0, %c0_i32 : i32, i32
  }
  func.func @transform_8(%arg0: i32) -> (i32, i32) {
    %c0_i32 = arith.constant 0 : i32
    %c0_i32_0 = arith.constant 0 : i32
    return %arg0, %c0_i32 : i32, i32
  }
}

</mosaic_0001>

<bundles_post_ra>
// kernel: tpu_custom_call.1
= control target key start
LH: loop header
LB: loop body
LE: loop exit
PB: predicated region body
PF: predicated region fallthrough
CT: control target
= control target key end

     0   :  { %14 = vsyncpa [#allocation3], 0  ;;  %s3373_s0 = inlined_call_operand.hbm [shape: bf16[128,896], index: 0, kind: input, shape index: {}]   ;;  %s3374_s1 = inlined_call_operand.hbm [shape: bf16[896,128], index: 1, kind: input, shape index: {}]   ;;  %s3375_s2 = inlined_call_operand.vmem [shape: f32[1,128], index: 2, kind: input, shape index: {}]   ;;  %s3376_s3 = inlined_call_operand.hbm [shape: bf16[128,256], index: 3, kind: input, shape index: {}]   ;;  %s3377_s4 = inlined_call_operand.vmem [shape: f32[1,256], index: 4, kind: input, shape index: {}]   ;;  %s3378_s5 = inlined_call_operand.hbm [shape: bf16[256,128], index: 5, kind: input, shape index: {}]   ;;  %s3379_s6 = inlined_call_operand.vmem [shape: f32[1,128], index: 6, kind: input, shape index: {}]   ;;  %s3380_s7 = inlined_call_operand.hbm [shape: f32[128,128], index: 7, kind: output, shape index: {0}]   ;;  %s3381_s8 = inlined_call_operand.hbm [shape: f32[128,128], index: 8, kind: output, shape index: {1}]  }
   0x1   :  { %15 = vsyncpa [#allocation6], 0 }
   0x2   :  { %16 = vsyncpa [#allocation9], 0 }
   0x3   :  { %17 = vsyncpa [#allocation4], 0 }
   0x4   :  { %18 = vsyncpa [#allocation12], 0  ;;  %s2894_s27 = smov [#allocation5]   ;;  %s2752_s9 = scalar_lea.hbm %s3374_s1, 7168 }
   0x5   :  { %s36_s28 = sshll.u32 %s2894_s27, 4  ;;  %p2753_p0 = scmp.ne.s32.totalorder %s3374_s1, %s2752_s9  ;;  %s37_s28 = int_to_ptr.vmem [resolvable:$true] %s36_s28 }
   0x6   :  { %p2756_p1 = scmp.lt.u32.totalorder %s2752_s9, %s3374_s1 }
   0x8   :  { %p2758_p2 = pnand %p2756_p1, %p2753_p0 }
   0xa   :  { %2761 = shalt.err (!%p2758_p2)
}
   0xb   :  { %s2762_s14 = scalar_lea.vmem %s37_s28, 7168  ;;  %p2767_p4 = scmp.lt.s32.totalorder %s37_s28, %s37_s28 }
   0xc   :  { %p2763_p3 = scmp.ne.s32.totalorder %s37_s28, %s2762_s14  ;;  %p2768_p5 = scmp.lt.s32.totalorder %s2762_s14, %s2762_s14 }
   0xe   :  { %p2769_p6 = por %p2768_p5, %p2767_p4 }
  0x10   :  { %p2770_p7 = pnand %p2769_p6, %p2763_p3 }
  0x12   :  { %2773 = shalt.err (!%p2770_p7)
}
  0x13   :  { %s2895_s15 = smov 64   ;;  %s2896_s16 = smov 4  }
  0x14   :  { %42 = dma.hbm_to_vmem [thread:$0]  %s3374_s1, 7168, %s37_s28, [#allocation6], %s2895_s15, %s2895_s15, %s2896_s16  }
  0x15   :  { %s2897_s19 = smov [#allocation2]   ;;  %s2774_s23 = scalar_lea.hbm %s3373_s0, 7168 }
  0x16   :  { %s24_s20 = sshll.u32 %s2897_s19, 4  ;;  %p2775_p8 = scmp.ne.s32.totalorder %s3373_s0, %s2774_s23  ;;  %s25_s20 = int_to_ptr.vmem [resolvable:$true] %s24_s20 }
  0x17   :  { %p2778_p9 = scmp.lt.u32.totalorder %s2774_s23, %s3373_s0 }
  0x19   :  { %p2780_p10 = pnand %p2778_p9, %p2775_p8 }
  0x1b   :  { %2783 = shalt.err (!%p2780_p10)
}
  0x1c   :  { %s2784_s29 = scalar_lea.vmem %s25_s20, 7168  ;;  %p2789_p12 = scmp.lt.s32.totalorder %s25_s20, %s25_s20 }
  0x1d   :  { %p2785_p11 = scmp.ne.s32.totalorder %s25_s20, %s2784_s29  ;;  %p2790_p13 = scmp.lt.s32.totalorder %s2784_s29, %s2784_s29 }
  0x1f   :  { %p2791_p0 = por %p2790_p13, %p2789_p12 }
  0x21   :  { %p2792_p1 = pnand %p2791_p0, %p2785_p11 }
  0x23   :  { %2795 = shalt.err (!%p2792_p1)
}
  0x24   :  { %s2898_s1 = smov 448   ;;  %s2899_s28 = smov 28  }
  0x25   :  { %30 = dma.hbm_to_vmem [thread:$0]  %s3373_s0, 7168, %s25_s20, [#allocation3], %s2898_s1, %s2898_s1, %s2899_s28  }
  0x26   :  { %s2900_s10 = smov [#allocation7]   ;;  %s2796_s14 = scalar_lea.hbm %s3376_s3, 2048 }
  0x27   :  { %s50_s11 = sshll.u32 %s2900_s10, 4  ;;  %p2797_p2 = scmp.ne.s32.totalorder %s3376_s3, %s2796_s14  ;;  %s51_s11 = int_to_ptr.vmem [resolvable:$true] %s50_s11 }
  0x28   :  { %p2800_p3 = scmp.lt.u32.totalorder %s2796_s14, %s3376_s3 }
  0x2a   :  { %p2802_p4 = pnand %p2800_p3, %p2797_p2 }
  0x2c   :  { %2805 = shalt.err (!%p2802_p4)
}
  0x2d   :  { %s2806_s22 = scalar_lea.vmem %s51_s11, 2048  ;;  %p2811_p6 = scmp.lt.s32.totalorder %s51_s11, %s51_s11 }
  0x2e   :  { %p2807_p5 = scmp.ne.s32.totalorder %s51_s11, %s2806_s22  ;;  %p2812_p7 = scmp.lt.s32.totalorder %s2806_s22, %s2806_s22 }
  0x30   :  { %p2813_p8 = por %p2812_p7, %p2811_p6 }
  0x32   :  { %p2814_p9 = pnand %p2813_p8, %p2807_p5 }
  0x34   :  { %2817 = shalt.err (!%p2814_p9)
}
  0x35   :  { %s2901_s0 = smov 128   ;;  %s2902_s20 = smov 8  }
  0x36   :  { %56 = dma.hbm_to_vmem [thread:$0]  %s3376_s3, 2048, %s51_s11, [#allocation6], %s2901_s0, %s2901_s0, %s2902_s20  }
  0x37   :  { %s2903_s25 = smov [#allocation8]   ;;  %s2818_s1 = scalar_lea.hbm %s3378_s5, 2048 }
  0x38   :  { %s64_s26 = sshll.u32 %s2903_s25, 4  ;;  %p2819_p10 = scmp.ne.s32.totalorder %s3378_s5, %s2818_s1  ;;  %s65_s26 = int_to_ptr.vmem [resolvable:$true] %s64_s26 }
  0x39   :  { %p2822_p11 = scmp.lt.u32.totalorder %s2818_s1, %s3378_s5 }
  0x3b   :  { %p2824_p12 = pnand %p2822_p11, %p2819_p10 }
  0x3d   :  { %2827 = shalt.err (!%p2824_p12)
}
  0x3e   :  { %s2828_s12 = scalar_lea.vmem %s65_s26, 2048  ;;  %p2833_p0 = scmp.lt.s32.totalorder %s65_s26, %s65_s26 }
  0x3f   :  { %p2829_p13 = scmp.ne.s32.totalorder %s65_s26, %s2828_s12  ;;  %p2834_p1 = scmp.lt.s32.totalorder %s2828_s12, %s2828_s12 }
  0x41   :  { %p2835_p2 = por %p2834_p1, %p2833_p0 }
  0x43   :  { %p2836_p3 = pnand %p2835_p2, %p2829_p13 }
  0x45   :  { %2839 = shalt.err (!%p2836_p3)
}
  0x46   :  { %70 = dma.hbm_to_vmem [thread:$0]  %s3378_s5, 2048, %s65_s26, [#allocation9], %s2895_s15, %s2895_s15, %s2896_s16  }
  0x47   :  { %2884 = dma.done.wait [#allocation3], 7168  }
  0x48   :  { %2885 = vsyncadd [#allocation3], 4294960128 }
  0x49   :  { %2886 = dma.done.wait [#allocation6], 9216  }
  0x4a   :  { %2887 = vsyncadd [#allocation6], 4294958080 }
  0x4b   :  { %2888 = dma.done.wait [#allocation9], 2048  }
  0x4c   :  { %2889 = vsyncadd [#allocation9], 4294965248  ;;  %v2512_v0 = vld [vmem:[#allocation5 + $0x40] sm:$0xff]   ;;  %v2516_v4 = vld [vmem:[#allocation5 + $0x48] sm:$0xff]  }
  0x4d   :  { %v2513_v1 = vld [vmem:[#allocation5] sm:$0xff]   ;;  %2179 = vmatprep.subr.bf16.mxu0 %v2512_v0  ;;  %v2517_v5 = vld [vmem:[#allocation5 + $0x8] sm:$0xff]   ;;  %v2520_v8 = vld [vmem:[#allocation5 + $0x50] sm:$0xff]  }
  0x4e   :  { %v2514_v2 = vld [vmem:[#allocation5 + $0xc0] sm:$0xff]   ;;  %2180 = vmatpush3.bf16.msra.mxu0 %v2513_v1  ;;  %v2518_v6 = vld [vmem:[#allocation5 + $0xc8] sm:$0xff]   ;;  %v2521_v9 = vld [vmem:[#allocation5 + $0x10] sm:$0xff]  }
  0x4f   :  { %v2515_v3 = vld [vmem:[#allocation5 + $0x80] sm:$0xff]   ;;  %2243 = vmatprep.subr.bf16.mxu1 %v2514_v2  ;;  %2181 = vmatprep.subr.bf16.mxu0 %v2516_v4  ;;  %v2519_v7 = vld [vmem:[#allocation5 + $0x88] sm:$0xff]   ;;  %v2522_v10 = vld [vmem:[#allocation5 + $0xd0] sm:$0xff]  }
  0x50   :  { %2244 = vmatpush3.bf16.msra.mxu1 %v2515_v3  ;;  %v2523_v11 = vld [vmem:[#allocation5 + $0x90] sm:$0xff]   ;;  %v2524_v12 = vld [vmem:[#allocation5 + $0x58] sm:$0xff]   ;;  %v2528_v16 = vld [vmem:[#allocation5 + $0x60] sm:$0xff]  }
  0x51   :  { %2245 = vmatprep.subr.bf16.mxu1 %v2518_v6  ;;  %v2525_v13 = vld [vmem:[#allocation5 + $0x18] sm:$0xff]   ;;  %v2529_v17 = vld [vmem:[#allocation5 + $0x20] sm:$0xff]   ;;  %v2532_v20 = vld [vmem:[#allocation5 + $0x68] sm:$0xff]  }
  0x52   :  { %2182 = vmatpush3.bf16.msra.mxu0 %v2517_v5  ;;  %v2526_v14 = vld [vmem:[#allocation5 + $0xd8] sm:$0xff]   ;;  %v2530_v18 = vld [vmem:[#allocation5 + $0xe0] sm:$0xff]   ;;  %v2533_v21 = vld [vmem:[#allocation5 + $0x28] sm:$0xff]  }
  0x53   :  { %2183 = vmatprep.subr.bf16.mxu0 %v2520_v8  ;;  %v2527_v15 = vld [vmem:[#allocation5 + $0x98] sm:$0xff]   ;;  %v2531_v19 = vld [vmem:[#allocation5 + $0xa0] sm:$0xff]   ;;  %v2534_v22 = vld [vmem:[#allocation5 + $0xe8] sm:$0xff]  }
  0x54   :  { %2246 = vmatpush3.bf16.msra.mxu1 %v2519_v7  ;;  %v2535_v23 = vld [vmem:[#allocation5 + $0xa8] sm:$0xff]   ;;  %v2536_v24 = vld [vmem:[#allocation5 + $0x70] sm:$0xff]   ;;  %v2540_v28 = vld [vmem:[#allocation5 + $0x78] sm:$0xff]  }
  0x55   :  { %2247 = vmatprep.subr.bf16.mxu1 %v2522_v10  ;;  %v2537_v25 = vld [vmem:[#allocation5 + $0x30] sm:$0xff]   ;;  %v2541_v29 = vld [vmem:[#allocation5 + $0x38] sm:$0xff]   ;;  %v2545_v32 = vld [vmem:[#allocation2 + $0x4] ss:$28 sps:$4 sm:$0xff]  }
  0x56   :  { %2184 = vmatpush3.bf16.msra.mxu0 %v2521_v9  ;;  %v2538_v26 = vld [vmem:[#allocation5 + $0xf0] sm:$0xff]   ;;  %v2542_v30 = vld [vmem:[#allocation5 + $0xf8] sm:$0xff]   ;;  %925 = vmatprep.mubr.bf16.mxu0 %v2545_v32  ;;  %v2547_v34 = vld [vmem:[#allocation5 + $0x140] sm:$0xff]  }
  0x57   :  { %2185 = vmatprep.subr.bf16.mxu0 %v2524_v12  ;;  %v2539_v27 = vld [vmem:[#allocation5 + $0xb0] sm:$0xff]   ;;  %v2543_v31 = vld [vmem:[#allocation2] ss:$28 sps:$4 sm:$0xff]   ;;  %v2548_v35 = vld [vmem:[#allocation2 + $0x8] ss:$28 sps:$4 sm:$0xff]  }
  0x58   :  { %2248 = vmatpush3.bf16.msra.mxu1 %v2523_v11  ;;  %v2546_v33 = vld [vmem:[#allocation5 + $0xb8] sm:$0xff]   ;;  %v2550_v36 = vld [vmem:[#allocation2 + $0xc] ss:$28 sps:$4 sm:$0xff]   ;;  %v2551_v37 = vld [vmem:[#allocation5 + $0x100] sm:$0xff]  }
  0x59   :  { %2249 = vmatprep.subr.bf16.mxu1 %v2526_v14  ;;  %1022 = vmatprep.mubr.bf16.mxu1 %v2550_v36  ;;  %v2552_v38 = vld [vmem:[#allocation5 + $0x180] sm:$0xff]   ;;  %v2553_v39 = vld [vmem:[#allocation2 + $0x3c] ss:$28 sps:$4 sm:$0xff]   ;;  %v2556_v41 = vld [vmem:[#allocation5 + $0x148] sm:$0xff]  }
  0x5a   :  { %2186 = vmatpush3.bf16.msra.mxu0 %v2525_v13  ;;  %v2555_v40 = vld [vmem:[#allocation2 + $0x38] ss:$28 sps:$4 sm:$0xff]   ;;  %v2557_v42 = vld [vmem:[#allocation2 + $0x44] ss:$28 sps:$4 sm:$0xff]   ;;  %v2559_v43 = vld [vmem:[#allocation5 + $0x108] sm:$0xff]  }
  0x5b   :  { %2187 = vmatprep.subr.bf16.mxu0 %v2528_v16  ;;  %v2560_v44 = vld [vmem:[#allocation2 + $0x40] ss:$28 sps:$4 sm:$0xff]   ;;  %v2561_v45 = vld [vmem:[#allocation5 + $0x188] sm:$0xff]   ;;  %v2562_v46 = vld [vmem:[#allocation2 + $0x74] ss:$28 sps:$4 sm:$0xff]  }
  0x5c   :  { %2250 = vmatpush3.bf16.msra.mxu1 %v2527_v15  ;;  %v2565_v47 = vld [vmem:[#allocation5 + $0x150] sm:$0xff]   ;;  %v2566_v48 = vld [vmem:[#allocation2 + $0x7c] ss:$28 sps:$4 sm:$0xff]   ;;  %v2571_v52 = vld [vmem:[#allocation2 + $0xac] ss:$28 sps:$4 sm:$0xff]  }
  0x5d   :  { %2251 = vmatprep.subr.bf16.mxu1 %v2530_v18  ;;  %v2564_v49 = vld [vmem:[#allocation2 + $0x70] ss:$28 sps:$4 sm:$0xff]   ;;  %v2569_v53 = vld [vmem:[#allocation2 + $0x78] ss:$28 sps:$4 sm:$0xff]   ;;  %v2573_v58 = vld [vmem:[#allocation2 + $0xa8] ss:$28 sps:$4 sm:$0xff]  }
  0x5e   :  { %2188 = vmatpush3.bf16.msra.mxu0 %v2529_v17  ;;  %v2568_v50 = vld [vmem:[#allocation5 + $0x110] sm:$0xff]   ;;  %v2574_v54 = vld [vmem:[#allocation5 + $0x158] sm:$0xff]   ;;  %v2580_v59 = vld [vmem:[#allocation2 + $0xe4] ss:$28 sps:$4 sm:$0xff]  }
  0x5f   :  { %2189 = vmatprep.subr.bf16.mxu0 %v2532_v20  ;;  %v2570_v51 = vld [vmem:[#allocation5 + $0x190] sm:$0xff]   ;;  %v2577_v56 = vld [vmem:[#allocation5 + $0x118] sm:$0xff]   ;;  %v2583_v60 = vld [vmem:[#allocation5 + $0x160] sm:$0xff]  }
  0x60   :  { %2252 = vmatpush3.bf16.msra.mxu1 %v2531_v19  ;;  %v2575_v55 = vld [vmem:[#allocation2 + $0xb4] ss:$28 sps:$4 sm:$0xff]   ;;  %v2579_v57 = vld [vmem:[#allocation5 + $0x198] sm:$0xff]   ;;  %v2586_v62 = vld [vmem:[#allocation5 + $0x120] sm:$0xff]  }
  0x61   :  { %2253 = vmatprep.subr.bf16.mxu1 %v2534_v22  ;;  %v2578_v61 = vld [vmem:[#allocation2 + $0xb0] ss:$28 sps:$4 sm:$0xff]   ;;  %v2588_v0 = vld [vmem:[#allocation5 + $0x1a0] sm:$0xff]   ;;  %v2589_v3 = vld [vmem:[#allocation2 + $0x11c] ss:$28 sps:$4 sm:$0xff]  }
  0x62   :  { %2190 = vmatpush3.bf16.msra.mxu0 %v2533_v21  ;;  %v2584_v63 = vld [vmem:[#allocation2 + $0xec] ss:$28 sps:$4 sm:$0xff]   ;;  %v2582_v2 = vld [vmem:[#allocation2 + $0xe0] ss:$28 sps:$4 sm:$0xff]   ;;  %v2601_v8 = vld [vmem:[#allocation5 + $0x170] sm:$0xff]  }
  0x63   :  { %2191 = vmatprep.subr.bf16.mxu0 %v2536_v24  ;;  %v2592_v1 = vld [vmem:[#allocation5 + $0x168] sm:$0xff]   ;;  %v2593_v7 = vld [vmem:[#allocation2 + $0x124] ss:$28 sps:$4 sm:$0xff]   ;;  %v2591_v9 = vld [vmem:[#allocation2 + $0x118] ss:$28 sps:$4 sm:$0xff]  }
  0x64   :  { %2254 = vmatpush3.bf16.msra.mxu1 %v2535_v23  ;;  %v2595_v4 = vld [vmem:[#allocation5 + $0x128] sm:$0xff]   ;;  %v2604_v10 = vld [vmem:[#allocation5 + $0x130] sm:$0xff]   ;;  %v2596_v12 = vld [vmem:[#allocation2 + $0x120] ss:$28 sps:$4 sm:$0xff]  }
  0x65   :  { %2255 = vmatprep.subr.bf16.mxu1 %v2538_v26  ;;  %v2597_v5 = vld [vmem:[#allocation5 + $0x1a8] sm:$0xff]   ;;  %v2606_v11 = vld [vmem:[#allocation5 + $0x1b0] sm:$0xff]   ;;  %v2610_v14 = vld [vmem:[#allocation5 + $0x178] sm:$0xff]  }
  0x66   :  { %2192 = vmatpush3.bf16.msra.mxu0 %v2537_v25  ;;  %v2587_v6 = vld [vmem:[#allocation2 + $0xe8] ss:$28 sps:$4 sm:$0xff]   ;;  %v2598_v13 = vld [vmem:[#allocation2 + $0x154] ss:$28 sps:$4 sm:$0xff]   ;;  %v2602_v15 = vld [vmem:[#allocation2 + $0x15c] ss:$28 sps:$4 sm:$0xff]  }
  0x67   :  { %2193 = vmatprep.subr.bf16.mxu0 %v2540_v28  ;;  %v2613_v16 = vld [vmem:[#allocation5 + $0x138] sm:$0xff]   ;;  %v2600_v18 = vld [vmem:[#allocation2 + $0x150] ss:$28 sps:$4 sm:$0xff]   ;;  %v2609_v22 = vld [vmem:[#allocation2 + $0x188] ss:$28 sps:$4 sm:$0xff]  }
  0x68   :  { %2256 = vmatpush3.bf16.msra.mxu1 %v2539_v27  ;;  %v2615_v17 = vld [vmem:[#allocation5 + $0x1b8] sm:$0xff]   ;;  %v2607_v19 = vld [vmem:[#allocation2 + $0x18c] ss:$28 sps:$4 sm:$0xff]   ;;  %v2611_v21 = vld [vmem:[#allocation2 + $0x194] ss:$28 sps:$4 sm:$0xff]  }
  0x69   :  { %2257 = vmatprep.subr.bf16.mxu1 %v2542_v30  ;;  %v2605_v20 = vld [vmem:[#allocation2 + $0x158] ss:$28 sps:$4 sm:$0xff]   ;;  %v2614_v24 = vld [vmem:[#allocation2 + $0x190] ss:$28 sps:$4 sm:$0xff]   ;;  %v2623_v30 = vld [vmem:[#allocation2 + $0x48] ss:$28 sps:$4 sm:$0xff]  }
  0x6a   :  { %2194 = vmatpush3.bf16.msra.mxu0 %v2541_v29  ;;  %v2618_v23 = vld [vmem:[#allocation2 + $0x14] ss:$28 sps:$4 sm:$0xff]   ;;  %v2621_v27 = vld [vmem:[#allocation2 + $0x4c] ss:$28 sps:$4 sm:$0xff]   ;;  %v2628_v32 = vld [vmem:[#allocation2 + $0xc0] ss:$28 sps:$4 sm:$0xff]  }
  0x6b   :  { %2307 = vmatprep.subr.bf16.mxu0 %v2547_v34  ;;  %v2619_v25 = vld [vmem:[#allocation2 + $0x18] ss:$28 sps:$4 sm:$0xff]   ;;  %v2616_v26 = vld [vmem:[#allocation2 + $0x10] ss:$28 sps:$4 sm:$0xff]   ;;  %v2627_v29 = vld [vmem:[#allocation2 + $0x88] ss:$28 sps:$4 sm:$0xff]  }
  0x6c   :  { %2258 = vmatpush3.bf16.msra.mxu1 %v2546_v33  ;;  %v2620_v28 = vld [vmem:[#allocation2 + $0x50] ss:$28 sps:$4 sm:$0xff]   ;;  %v2635_v33 = vld [vmem:[#allocation2 + $0xf8] ss:$28 sps:$4 sm:$0xff]   ;;  %v2626_v34 = vld [vmem:[#allocation2 + $0x80] ss:$28 sps:$4 sm:$0xff]  }
  0x6d   :  { %926 = vmatmul.mubr.bf16.vlgmr.msra.gmra.mrb[0].mxu0 %v2543_v31  ;;  %2451 = vmatprep.subr.bf16.mxu1 %v2552_v38  ;;  %v2624_v31 = vld [vmem:[#allocation2 + $0x84] ss:$28 sps:$4 sm:$0xff]   ;;  %v2636_v36 = vld [vmem:[#allocation2 + $0x130] ss:$28 sps:$4 sm:$0xff]  }
  0x6e   :  { %2308 = vmatpush3.bf16.msra.mxu0 %v2551_v37  ;;  %933 = vmatprep.mubr.bf16.mxu0 %v2553_v39  ;;  %v2643_v37 = vld [vmem:[#allocation2 + $0x168] ss:$28 sps:$4 sm:$0xff]   ;;  %v2632_v39 = vld [vmem:[#allocation2 + $0xf4] ss:$28 sps:$4 sm:$0xff]  }
  0x6f   :  { %1023 = vmatmul.mubr.bf16.vlgmr.msra.gmra.mrb[0].mxu1 %v2548_v35  ;;  %2309 = vmatprep.subr.bf16.mxu0 %v2556_v41  ;;  %v2629_v35 = vld [vmem:[#allocation2 + $0xbc] ss:$28 sps:$4 sm:$0xff]   ;;  %v2634_v41 = vld [vmem:[#allocation2 + $0xf0] ss:$28 sps:$4 sm:$0xff]  }
  0x70   :  { %2452 = vmatpush3.bf16.msra.mxu1 %v2552_v38  ;;  %1030 = vmatprep.mubr.bf16.mxu1 %v2557_v42  ;;  %v2631_v38 = vld [vmem:[#allocation2 + $0xb8] ss:$28 sps:$4 sm:$0xff]   ;;  %v2637_v42 = vld [vmem:[#allocation2 + $0x12c] ss:$28 sps:$4 sm:$0xff]  }
  0x71   :  { %2453 = vmatprep.subr.bf16.mxu1 %v2561_v45 }
  0x72   :  { %2310 = vmatpush3.bf16.msra.mxu0 %v2559_v43  ;;  %v2639_v43 = vld [vmem:[#allocation2 + $0x128] ss:$28 sps:$4 sm:$0xff]  }
  0x73   :  { %2311 = vmatprep.subr.bf16.mxu0 %v2565_v47  ;;  %v2647_v47 = vld [vmem:[#allocation2 + $0x198] ss:$28 sps:$4 sm:$0xff]  }
  0x74   :  { %2454 = vmatpush3.bf16.msra.mxu1 %v2561_v45  ;;  %v2642_v45 = vld [vmem:[#allocation2 + $0x160] ss:$28 sps:$4 sm:$0xff]  }
  0x75   :  { %934 = vmatmul.mubr.bf16.gmra.mrb[4].mxu0 %v2555_v40  ;;  %2455 = vmatprep.subr.bf16.mxu1 %v2570_v51  ;;  %v2644_v40 = vld [vmem:[#allocation2 + $0x1a0] ss:$28 sps:$4 sm:$0xff]  }
  0x76   :  { %941 = vmatprep.mubr.bf16.mxu0 %v2562_v46  ;;  %2312 = vmatpush3.bf16.msra.mxu0 %v2568_v50  ;;  %v2645_v46 = vld [vmem:[#allocation2 + $0x19c] ss:$28 sps:$4 sm:$0xff]  }
  0x77   :  { %1031 = vmatmul.mubr.bf16.gmra.mrb[4].mxu1 %v2560_v44  ;;  %2313 = vmatprep.subr.bf16.mxu0 %v2574_v54  ;;  %v2640_v44 = vld [vmem:[#allocation2 + $0x164] ss:$28 sps:$4 sm:$0xff]   ;;  %v2653_v50 = vld [vmem:[#allocation7 + $0x14] ss:$8 sps:$4 sm:$0xff]  }
  0x78   :  { %1038 = vmatprep.mubr.bf16.mxu1 %v2566_v48  ;;  %2456 = vmatpush3.bf16.msra.mxu1 %v2570_v51  ;;  %v2650_v48 = vld [vmem:[#allocation7 + $0x4] ss:$8 sps:$4 sm:$0xff]   ;;  %v2651_v51 = vld [vmem:[#allocation7 + $0x10] ss:$8 sps:$4 sm:$0xff]   ;;  %v2659_v54 = vld [vmem:[#allocation7 + $0x34] ss:$8 sps:$4 sm:$0xff]  }
  0x79   :  { %2457 = vmatprep.subr.bf16.mxu1 %v2579_v57 }
  0x7a   :  { %2314 = vmatpush3.bf16.msra.mxu0 %v2577_v56  ;;  %v2662_v56 = vld [vmem:[#allocation7 + $0x44] ss:$8 sps:$4 sm:$0xff]  }
  0x7b   :  { %2315 = vmatprep.subr.bf16.mxu0 %v2583_v60  ;;  %v2668_v60 = vld [vmem:[#allocation7 + $0x64] ss:$8 sps:$4 sm:$0xff]  }
  0x7c   :  { %2458 = vmatpush3.bf16.msra.mxu1 %v2579_v57  ;;  %v2660_v57 = vld [vmem:[#allocation7 + $0x40] ss:$8 sps:$4 sm:$0xff]  }
  0x7d   :  { %942 = vmatmul.mubr.bf16.gmra.mrb[8].mxu0 %v2564_v49  ;;  %2459 = vmatprep.subr.bf16.mxu1 %v2588_v0  ;;  %v2648_v49 = vld [vmem:[#allocation7] ss:$8 sps:$4 sm:$0xff]  }
  0x7e   :  { %949 = vmatprep.mubr.bf16.mxu0 %v2571_v52  ;;  %2316 = vmatpush3.bf16.msra.mxu0 %v2586_v62  ;;  %v2656_v52 = vld [vmem:[#allocation7 + $0x24] ss:$8 sps:$4 sm:$0xff]   ;;  %v2671_v62 = vld [vmem:[#allocation7 + $0x74] ss:$8 sps:$4 sm:$0xff]  }
  0x7f   :  { %1039 = vmatmul.mubr.bf16.gmra.mrb[8].mxu1 %v2569_v53  ;;  %2317 = vmatprep.subr.bf16.mxu0 %v2592_v1  ;;  %v2654_v53 = vld [vmem:[#allocation7 + $0x20] ss:$8 sps:$4 sm:$0xff]  }
  0x80   :  { %1046 = vmatprep.mubr.bf16.mxu1 %v2575_v55  ;;  %2460 = vmatpush3.bf16.msra.mxu1 %v2588_v0  ;;  %v2657_v55 = vld [vmem:[#allocation7 + $0x30] ss:$8 sps:$4 sm:$0xff]   ;;  %v2904_v0 = vmov 0  }
  0x81   :  { %2461 = vmatprep.subr.bf16.mxu1 %v2597_v5 }
  0x82   :  { %2318 = vmatpush3.bf16.msra.mxu0 %v2595_v4 }
  0x83   :  { %2319 = vmatprep.subr.bf16.mxu0 %v2601_v8 }
  0x84   :  { %2462 = vmatpush3.bf16.msra.mxu1 %v2597_v5 }
  0x85   :  { %950 = vmatmul.mubr.bf16.gmra.mrb[12].mxu0 %v2573_v58  ;;  %2463 = vmatprep.subr.bf16.mxu1 %v2606_v11  ;;  %v2665_v58 = vld [vmem:[#allocation7 + $0x54] ss:$8 sps:$4 sm:$0xff]  }
  0x86   :  { %957 = vmatprep.mubr.bf16.mxu0 %v2580_v59  ;;  %2320 = vmatpush3.bf16.msra.mxu0 %v2604_v10  ;;  %v2663_v59 = vld [vmem:[#allocation7 + $0x50] ss:$8 sps:$4 sm:$0xff]  }
  0x87   :  { %1047 = vmatmul.mubr.bf16.gmra.mrb[12].mxu1 %v2578_v61  ;;  %2321 = vmatprep.subr.bf16.mxu0 %v2610_v14  ;;  %v2666_v61 = vld [vmem:[#allocation7 + $0x60] ss:$8 sps:$4 sm:$0xff]  }
  0x88   :  { %1054 = vmatprep.mubr.bf16.mxu1 %v2584_v63  ;;  %2464 = vmatpush3.bf16.msra.mxu1 %v2606_v11  ;;  %v2669_v63 = vld [vmem:[#allocation7 + $0x70] ss:$8 sps:$4 sm:$0xff]  }
  0x89   :  { %2465 = vmatprep.subr.bf16.mxu1 %v2615_v17 }
  0x8a   :  { %2322 = vmatpush3.bf16.msra.mxu0 %v2613_v16  ;;  %v3017_v16 = vld [vmem:[#allocation8] sm:$0xff]  }
  0x8c   :  { %2466 = vmatpush3.bf16.msra.mxu1 %v2615_v17  ;;  %v3019_v17 = vld [vmem:[#allocation8 + $0x48] sm:$0xff]  }
  0x8d   :  { %958 = vmatmul.mubr.bf16.gmra.mrb[16].mxu0 %v2582_v2  ;;  %1413 = vmatprep.subr.bf16.mxu1 %v2650_v48  ;;  %v3013_v2 = vld [vmem:[%s3375_s2] ss:$0 sm:$0xff] }
  0x8e   :  { %965 = vmatprep.mubr.bf16.mxu0 %v2589_v3 }
  0x8f   :  { %1055 = vmatmul.mubr.bf16.gmra.mrb[16].mxu1 %v2587_v6 }
  0x90   :  { %1062 = vmatprep.mubr.bf16.mxu1 %v2593_v7 }
  0x95   :  { %966 = vmatmul.mubr.bf16.gmra.mrb[20].mxu0 %v2591_v9 }
  0x96   :  { %973 = vmatprep.mubr.bf16.mxu0 %v2598_v13 }
  0x97   :  { %1063 = vmatmul.mubr.bf16.gmra.mrb[20].mxu1 %v2596_v12 }
  0x98   :  { %1070 = vmatprep.mubr.bf16.mxu1 %v2602_v15  ;;  %v2672_v15 = vld [vmem:[#allocation8 + $0x40] sm:$0xff]  }
  0x99   :  { %2387 = vmatprep.subr.bf16.mxu0 %v2672_v15 }
  0x9d   :  { %974 = vmatmul.mubr.bf16.gmra.mrb[24].mxu0 %v2600_v18 }
  0x9e   :  { %981 = vmatprep.mubr.bf16.mxu0 %v2607_v19 }
  0x9f   :  { %1071 = vmatmul.mubr.bf16.gmra.mrb[24].mxu1 %v2605_v20 }
  0xa0   :  { %1078 = vmatprep.mubr.bf16.mxu1 %v2611_v21 }
  0xa5   :  { %982 = vmatmul.mubr.bf16.gmra.mrb[28].mxu0 %v2609_v22 }
  0xa6   :  { %1119 = vmatprep.mubr.bf16.mxu0 %v2618_v23  ;;  %v3026_v23 = vld [vmem:[#allocation8 + $0x8] sm:$0xff]  }
  0xa7   :  { %1079 = vmatmul.mubr.bf16.gmra.mrb[28].mxu1 %v2614_v24 }
  0xa8   :  { %2467 = vmatprep.mubr.bf16.mxu1 %v2619_v25 }
  0xad   :  { %1120 = vmatmul.mubr.bf16.vlgmr.msra.gmra.mrb[32].mxu0 %v2616_v26  ;;  %v3029_v26 = vld [vmem:[#allocation8 + $0x50] sm:$0xff]  }
  0xae   :  { %1127 = vmatprep.mubr.bf16.mxu0 %v2621_v27  ;;  %2388 = vmatpush3.bf16.msra.mxu0 %v3017_v16 }
  0xaf   :  { %2468 = vmatmul.mubr.bf16.vlgmr.msra.gmra.mrb[32].mxu1 %v2620_v28  ;;  %2389 = vmatprep.subr.bf16.mxu0 %v3019_v17 }
  0xb0   :  { %2471 = vmatprep.mubr.bf16.mxu1 %v2627_v29  ;;  %1414 = vmatpush1.bf16.msra.mxu1 %v2648_v49 }
  0xb1   :  { %1415 = vmatprep.subr.bf16.mxu1 %v2653_v50 }
  0xb2   :  { %2390 = vmatpush3.bf16.msra.mxu0 %v3026_v23 }
  0xb3   :  { %2391 = vmatprep.subr.bf16.mxu0 %v3029_v26 }
  0xb4   :  { %1416 = vmatpush1.bf16.msra.mxu1 %v2651_v51 }
  0xb5   :  { %1128 = vmatmul.mubr.bf16.gmra.mrb[36].mxu0 %v2623_v30  ;;  %1417 = vmatprep.subr.bf16.mxu1 %v2656_v52 }
  0xb6   :  { %1135 = vmatprep.mubr.bf16.mxu0 %v2624_v31 }
  0xb7   :  { %2472 = vmatmul.mubr.bf16.gmra.mrb[36].mxu1 %v2628_v32 }
  0xb8   :  { %2475 = vmatprep.mubr.bf16.mxu1 %v2635_v33  ;;  %1418 = vmatpush1.bf16.msra.mxu1 %v2654_v53 }
  0xb9   :  { %1419 = vmatprep.subr.bf16.mxu1 %v2659_v54  ;;  %v3051_v54 = vld [vmem:[#allocation8 + $0x20] sm:$0xff]  }
  0xbc   :  { %1420 = vmatpush1.bf16.msra.mxu1 %v2657_v55 }
  0xbd   :  { %1136 = vmatmul.mubr.bf16.gmra.mrb[40].mxu0 %v2626_v34  ;;  %1421 = vmatprep.subr.bf16.mxu1 %v2662_v56  ;;  %v3033_v34 = vld [vmem:[#allocation8 + $0x10] sm:$0xff]  }
  0xbe   :  { %1143 = vmatprep.mubr.bf16.mxu0 %v2629_v35  ;;  %2392 = vmatpush3.bf16.msra.mxu0 %v3033_v34 }
  0xbf   :  { %2476 = vmatmul.mubr.bf16.gmra.mrb[40].mxu1 %v2636_v36 }
  0xc0   :  { %2479 = vmatprep.mubr.bf16.mxu1 %v2643_v37  ;;  %1422 = vmatpush1.bf16.msra.mxu1 %v2660_v57  ;;  %v3037_v37 = vld [vmem:[#allocation8 + $0x58] sm:$0xff]   ;;  %v3055_v57 = vld [vmem:[#allocation8 + $0x68] sm:$0xff]  }
  0xc1   :  { %1423 = vmatprep.subr.bf16.mxu1 %v2665_v58  ;;  %2393 = vmatprep.subr.bf16.mxu0 %v3037_v37 }
  0xc4   :  { %1424 = vmatpush1.bf16.msra.mxu1 %v2663_v59 }
  0xc5   :  { %1144 = vmatmul.mubr.bf16.gmra.mrb[44].mxu0 %v2631_v38  ;;  %1425 = vmatprep.subr.bf16.mxu1 %v2668_v60 }
  0xc6   :  { %1151 = vmatprep.mubr.bf16.mxu0 %v2632_v39 }
  0xc7   :  { %2480 = vmatmul.mubr.bf16.gmra.mrb[44].mxu1 %v2644_v40 }
  0xc8   :  { %1426 = vmatpush1.bf16.msra.mxu1 %v2666_v61  ;;  %1445 = vmatprep.mubr.bf16.mxu1 %v2904_v0 }
  0xc9   :  { %1427 = vmatprep.subr.bf16.mxu1 %v2671_v62 }
  0xcc   :  { %1428 = vmatpush1.bf16.msra.mxu1 %v2669_v63  ;;  %v3062_v63 = vld [vmem:[#allocation8 + $0x28] sm:$0xff]  }
  0xcd   :  { %1152 = vmatmul.mubr.bf16.gmra.mrb[48].mxu0 %v2634_v41  ;;  %2483 = vmatprep.subr.bf16.mxu1 %v2672_v15 }
  0xce   :  { %1159 = vmatprep.mubr.bf16.mxu0 %v2637_v42 }
  0xd5   :  { %1160 = vmatmul.mubr.bf16.gmra.mrb[52].mxu0 %v2639_v43  ;;  %v3044_v43 = vld [vmem:[#allocation8 + $0x18] sm:$0xff]  }
  0xd6   :  { %1167 = vmatprep.mubr.bf16.mxu0 %v2640_v44  ;;  %2394 = vmatpush3.bf16.msra.mxu0 %v3044_v43 }
  0xdd   :  { %1168 = vmatmul.mubr.bf16.gmra.mrb[56].mxu0 %v2642_v45 }
  0xde   :  { %1175 = vmatprep.mubr.bf16.mxu0 %v2645_v46  ;;  %v3047_v46 = vld [vmem:[#allocation8 + $0x60] sm:$0xff]  }
  0xdf   :  { %2395 = vmatprep.subr.bf16.mxu0 %v3047_v46 }
  0xe0   :  { %2396 = vmatpush3.bf16.msra.mxu0 %v3051_v54 }
  0xe1   :  { %2397 = vmatprep.subr.bf16.mxu0 %v3055_v57 }
  0xe4   :  { %2398 = vmatpush3.bf16.msra.mxu0 %v3062_v63 }
  0xe5   :  { %1176 = vmatmul.mubr.bf16.gmra.mrb[60].mxu0 %v2647_v47 }
 0x140   :  { %v2195_v1 = vpop.f32.mrb[0].mxu0 }
 0x141   :  { %v2196_v3 = vpop.f32.mrb[1].mxu0 }
 0x142   :  { %v2197_v4 = vadd.f32 %v2196_v3, %v2195_v1  ;;  %v2198_v5 = vpop.f32.mrb[2].mxu0  ;;  %v2259_v6 = vpop.f32.mrb[0].mxu1 }
 0x143   :  { %v2199_v7 = vpop.f32.mrb[3].mxu0  ;;  %v2260_v10 = vpop.f32.mrb[1].mxu1 }
 0x144   :  { %v928_v8 = vadd.f32 %v2197_v4, %v3013_v2  ;;  %v2200_v9 = vadd.f32 %v2199_v7, %v2198_v5  ;;  %v2261_v11 = vadd.f32 %v2260_v10, %v2259_v6  ;;  %v2262_v12 = vpop.f32.mrb[2].mxu1 }
 0x145   :  { %v2263_v14 = vpop.f32.mrb[3].mxu1 }
 0x146   :  { %v931_v13 = vadd.f32 %v2200_v9, %v3013_v2  ;;  %v3021_v18 = vadd.f32 %v2261_v11, %v928_v8  ;;  %v2264_v19 = vadd.f32 %v2263_v14, %v2262_v12 }
 0x148   :  { %v2201_v20 = vpop.f32.mrb[4].mxu0  ;;  %v3023_v21 = vadd.f32 %v2264_v19, %v931_v13 }
 0x149   :  { %v2202_v22 = vpop.f32.mrb[5].mxu0 }
 0x14a   :  { %v2203_v24 = vadd.f32 %v2202_v22, %v2201_v20  ;;  %v2204_v25 = vpop.f32.mrb[6].mxu0  ;;  %v2265_v27 = vpop.f32.mrb[4].mxu1 }
 0x14b   :  { %v2205_v28 = vpop.f32.mrb[7].mxu0  ;;  %v2266_v31 = vpop.f32.mrb[5].mxu1 }
 0x14c   :  { %v936_v29 = vadd.f32 %v2203_v24, %v3013_v2  ;;  %v2206_v30 = vadd.f32 %v2205_v28, %v2204_v25  ;;  %v2267_v32 = vadd.f32 %v2266_v31, %v2265_v27  ;;  %v2268_v33 = vpop.f32.mrb[6].mxu1 }
 0x14d   :  { %v2269_v36 = vpop.f32.mrb[7].mxu1 }
 0x14e   :  { %v939_v35 = vadd.f32 %v2206_v30, %v3013_v2  ;;  %v3039_v38 = vadd.f32 %v2267_v32, %v936_v29  ;;  %v2270_v39 = vadd.f32 %v2269_v36, %v2268_v33 }
 0x150   :  { %v2207_v40 = vpop.f32.mrb[8].mxu0  ;;  %v3041_v41 = vadd.f32 %v2270_v39, %v939_v35 }
 0x151   :  { %v2208_v42 = vpop.f32.mrb[9].mxu0 }
 0x152   :  { %v2209_v44 = vadd.f32 %v2208_v42, %v2207_v40  ;;  %v2210_v45 = vpop.f32.mrb[10].mxu0  ;;  %v2271_v47 = vpop.f32.mrb[8].mxu1 }
 0x153   :  { %v2211_v48 = vpop.f32.mrb[11].mxu0  ;;  %v2272_v51 = vpop.f32.mrb[9].mxu1 }
 0x154   :  { %v944_v49 = vadd.f32 %v2209_v44, %v3013_v2  ;;  %v2212_v50 = vadd.f32 %v2211_v48, %v2210_v45  ;;  %v2273_v52 = vadd.f32 %v2272_v51, %v2271_v47  ;;  %v2274_v53 = vpop.f32.mrb[10].mxu1 }
 0x155   :  { %v2275_v56 = vpop.f32.mrb[11].mxu1 }
 0x156   :  { %v947_v55 = vadd.f32 %v2212_v50, %v3013_v2  ;;  %v3057_v58 = vadd.f32 %v2273_v52, %v944_v49  ;;  %v2276_v59 = vadd.f32 %v2275_v56, %v2274_v53 }
 0x158   :  { %v2213_v60 = vpop.f32.mrb[12].mxu0  ;;  %v3059_v61 = vadd.f32 %v2276_v59, %v947_v55 }
 0x159   :  { %v2214_v62 = vpop.f32.mrb[13].mxu0 }
 0x15a   :  { %v2215_v1 = vadd.f32 %v2214_v62, %v2213_v60  ;;  %v2216_v3 = vpop.f32.mrb[14].mxu0  ;;  %v2277_v4 = vpop.f32.mrb[12].mxu1 }
 0x15b   :  { %v2217_v5 = vpop.f32.mrb[15].mxu0  ;;  %v2278_v8 = vpop.f32.mrb[13].mxu1 }
 0x15c   :  { %v952_v6 = vadd.f32 %v2215_v1, %v3013_v2  ;;  %v2218_v7 = vadd.f32 %v2217_v5, %v2216_v3  ;;  %v2279_v9 = vadd.f32 %v2278_v8, %v2277_v4  ;;  %v2280_v10 = vpop.f32.mrb[14].mxu1 }
 0x15d   :  { %v2281_v12 = vpop.f32.mrb[15].mxu1 }
 0x15e   :  { %v955_v11 = vadd.f32 %v2218_v7, %v3013_v2  ;;  %v3068_v13 = vadd.f32 %v2279_v9, %v952_v6  ;;  %v2282_v14 = vadd.f32 %v2281_v12, %v2280_v10 }
 0x160   :  { %v2219_v15 = vpop.f32.mrb[16].mxu0  ;;  %v3070_v19 = vadd.f32 %v2282_v14, %v955_v11 }
 0x161   :  { %v2220_v20 = vpop.f32.mrb[17].mxu0 }
 0x162   :  { %v2221_v22 = vadd.f32 %v2220_v20, %v2219_v15  ;;  %v2222_v24 = vpop.f32.mrb[18].mxu0  ;;  %v2283_v25 = vpop.f32.mrb[16].mxu1 }
 0x163   :  { %v2223_v27 = vpop.f32.mrb[19].mxu0  ;;  %v2284_v30 = vpop.f32.mrb[17].mxu1 }
 0x164   :  { %v960_v28 = vadd.f32 %v2221_v22, %v3013_v2  ;;  %v2224_v29 = vadd.f32 %v2223_v27, %v2222_v24  ;;  %v2285_v31 = vadd.f32 %v2284_v30, %v2283_v25  ;;  %v2286_v32 = vpop.f32.mrb[18].mxu1 }
 0x165   :  { %v2287_v35 = vpop.f32.mrb[19].mxu1 }
 0x166   :  { %v963_v33 = vadd.f32 %v2224_v29, %v3013_v2  ;;  %v3074_v36 = vadd.f32 %v2285_v31, %v960_v28  ;;  %v2288_v39 = vadd.f32 %v2287_v35, %v2286_v32 }
 0x168   :  { %v2225_v40 = vpop.f32.mrb[20].mxu0  ;;  %v3076_v42 = vadd.f32 %v2288_v39, %v963_v33 }
 0x169   :  { %v2226_v44 = vpop.f32.mrb[21].mxu0 }
 0x16a   :  { %v2227_v45 = vadd.f32 %v2226_v44, %v2225_v40  ;;  %v2228_v47 = vpop.f32.mrb[22].mxu0  ;;  %v2289_v48 = vpop.f32.mrb[20].mxu1 }
 0x16b   :  { %v2229_v49 = vpop.f32.mrb[23].mxu0  ;;  %v2290_v52 = vpop.f32.mrb[21].mxu1 }
 0x16c   :  { %v968_v50 = vadd.f32 %v2227_v45, %v3013_v2  ;;  %v2230_v51 = vadd.f32 %v2229_v49, %v2228_v47  ;;  %v2291_v53 = vadd.f32 %v2290_v52, %v2289_v48  ;;  %v2292_v55 = vpop.f32.mrb[22].mxu1 }
 0x16d   :  { %v2293_v59 = vpop.f32.mrb[23].mxu1 }
 0x16e   :  { %v971_v56 = vadd.f32 %v2230_v51, %v3013_v2  ;;  %v3080_v60 = vadd.f32 %v2291_v53, %v968_v50  ;;  %v2294_v62 = vadd.f32 %v2293_v59, %v2292_v55 }
 0x170   :  { %v2231_v1 = vpop.f32.mrb[24].mxu0  ;;  %v3082_v3 = vadd.f32 %v2294_v62, %v971_v56 }
 0x171   :  { %v2232_v4 = vpop.f32.mrb[25].mxu0 }
 0x172   :  { %v2233_v5 = vadd.f32 %v2232_v4, %v2231_v1  ;;  %v2234_v6 = vpop.f32.mrb[26].mxu0  ;;  %v2295_v7 = vpop.f32.mrb[24].mxu1 }
 0x173   :  { %v2235_v8 = vpop.f32.mrb[27].mxu0  ;;  %v2296_v11 = vpop.f32.mrb[25].mxu1 }
 0x174   :  { %v976_v9 = vadd.f32 %v2233_v5, %v3013_v2  ;;  %v2236_v10 = vadd.f32 %v2235_v8, %v2234_v6  ;;  %v2297_v12 = vadd.f32 %v2296_v11, %v2295_v7  ;;  %v2298_v14 = vpop.f32.mrb[26].mxu1 }
 0x175   :  { %v2299_v20 = vpop.f32.mrb[27].mxu1 }
 0x176   :  { %v979_v15 = vadd.f32 %v2236_v10, %v3013_v2  ;;  %v3086_v22 = vadd.f32 %v2297_v12, %v976_v9  ;;  %v2300_v24 = vadd.f32 %v2299_v20, %v2298_v14 }
 0x178   :  { %v2237_v25 = vpop.f32.mrb[28].mxu0  ;;  %v3088_v27 = vadd.f32 %v2300_v24, %v979_v15 }
 0x179   :  { %v2238_v28 = vpop.f32.mrb[29].mxu0 }
 0x17a   :  { %v2239_v29 = vadd.f32 %v2238_v28, %v2237_v25  ;;  %v2240_v30 = vpop.f32.mrb[30].mxu0  ;;  %v2301_v31 = vpop.f32.mrb[28].mxu1 }
 0x17b   :  { %v2241_v32 = vpop.f32.mrb[31].mxu0  ;;  %v2302_v39 = vpop.f32.mrb[29].mxu1 }
 0x17c   :  { %v984_v33 = vadd.f32 %v2239_v29, %v3013_v2  ;;  %v2242_v35 = vadd.f32 %v2241_v32, %v2240_v30  ;;  %v2303_v40 = vadd.f32 %v2302_v39, %v2301_v31  ;;  %v2304_v44 = vpop.f32.mrb[30].mxu1 }
 0x17d   :  { %v2305_v47 = vpop.f32.mrb[31].mxu1 }
 0x17e   :  { %v987_v45 = vadd.f32 %v2242_v35, %v3013_v2  ;;  %v3092_v48 = vadd.f32 %v2303_v40, %v984_v33  ;;  %v2306_v49 = vadd.f32 %v2305_v47, %v2304_v44 }
 0x180   :  { %v2323_v50 = vpop.f32.mrb[32].mxu0  ;;  %v3094_v51 = vadd.f32 %v2306_v49, %v987_v45 }
 0x181   :  { %v2324_v52 = vpop.f32.mrb[33].mxu0 }
 0x182   :  { %v2325_v53 = vadd.f32 %v2324_v52, %v2323_v50  ;;  %v2326_v55 = vpop.f32.mrb[34].mxu0  ;;  %v2469_v56 = vpop.f32.mrb[32].mxu1 }
 0x183   :  { %v2327_v59 = vpop.f32.mrb[35].mxu0  ;;  %v1218_v4 = vpop.f32.mrb[33].mxu1 }
 0x184   :  { %v2328_v62 = vadd.f32 %v2327_v59, %v2326_v55  ;;  %v1122_v1 = vadd.f32 %v2325_v53, %v3021_v18  ;;  %v2470_v5 = vpop.f32.mrb[34].mxu1 }
 0x185   :  { %v1221_v7 = vpop.f32.mrb[35].mxu1 }
 0x186   :  { %v1219_v6 = vadd.f32 %v1218_v4, %v1122_v1  ;;  %v1125_v2 = vadd.f32 %v2328_v62, %v3023_v21 }
 0x188   :  { %v1222_v8 = vadd.f32 %v1221_v7, %v1125_v2  ;;  %v2329_v9 = vpop.f32.mrb[36].mxu0  ;;  %v1281_v11 = vmax.f32 %v1219_v6, 0.0 }
 0x189   :  { %v2330_v10 = vpop.f32.mrb[37].mxu0 }
 0x18a   :  { %v1282_v12 = vmax.f32 %v1222_v8, 0.0  ;;  %v2331_v14 = vadd.f32 %v2330_v10, %v2329_v9  ;;  %v2332_v15 = vpop.f32.mrb[38].mxu0  ;;  %v2473_v24 = vpop.f32.mrb[36].mxu1 }
 0x18b   :  { %v2333_v20 = vpop.f32.mrb[39].mxu0  ;;  %v1234_v18 = vpop.f32.mrb[37].mxu1 }
 0x18c   :  { %v1297_v25 = vpack.c.bf16 %v1282_v12, %v1281_v11  ;;  %v1130_v28 = vadd.f32 %v2331_v14, %v3039_v38  ;;  %v2334_v29 = vadd.f32 %v2333_v20, %v2332_v15  ;;  %v2474_v30 = vpop.f32.mrb[38].mxu1 }
 0x18d   :  { %v1237_v21 = vpop.f32.mrb[39].mxu1 }
 0x18e   :  { %v1227_v31 = vadd.f32 %v2469_v56, %v1130_v28  ;;  %v1133_v32 = vadd.f32 %v2334_v29, %v3041_v41  ;;  %1446 = vmatmul.mubr.bf16.vlgmr.msra.gmra.mrb[48].mxu1 %v1297_v25 }
 0x18f   :  { %1455 = vmatprep.mubr.bf16.mxu1 %v2904_v0  ;;  %2491 = vmatpush3.bf16.msra.mxu1 %v3017_v16 }
 0x190   :  { %v1230_v33 = vadd.f32 %v2470_v5, %v1133_v32  ;;  %v2335_v35 = vpop.f32.mrb[40].mxu0  ;;  %2484 = vmatprep.subr.bf16.mxu1 %v3019_v17  ;;  %v1283_v40 = vmax.f32 %v1227_v31, 0.0 }
 0x191   :  { %v2336_v39 = vpop.f32.mrb[41].mxu0 }
 0x192   :  { %v1284_v44 = vmax.f32 %v1230_v33, 0.0  ;;  %v2337_v38 = vadd.f32 %v2336_v39, %v2335_v35  ;;  %v2338_v45 = vpop.f32.mrb[42].mxu0  ;;  %v3103_v49 = vpop.f32.mrb[40].mxu1 }
 0x193   :  { %v2339_v47 = vpop.f32.mrb[43].mxu0  ;;  %2492 = vmatpush3.bf16.msra.mxu1 %v3026_v23  ;;  %v1250_v53 = vpop.f32.mrb[41].mxu1 }
 0x194   :  { %v2340_v41 = vadd.f32 %v2339_v47, %v2338_v45  ;;  %v1138_v50 = vadd.f32 %v2337_v38, %v3057_v58  ;;  %v1298_v52 = vpack.c.bf16 %v1284_v44, %v1283_v40  ;;  %2485 = vmatprep.subr.bf16.mxu1 %v3029_v26  ;;  %v2478_v16 = vpop.f32.mrb[42].mxu1 }
 0x195   :  { %v1253_v56 = vpop.f32.mrb[43].mxu1 }
 0x196   :  { %v1235_v55 = vadd.f32 %v1234_v18, %v1138_v50  ;;  %v1141_v17 = vadd.f32 %v2340_v41, %v3059_v61  ;;  %1456 = vmatmul.mubr.bf16.gmra.mrb[52].mxu1 %v1298_v52 }
 0x197   :  { %1465 = vmatprep.mubr.bf16.mxu1 %v2904_v0  ;;  %2493 = vmatpush3.bf16.msra.mxu1 %v3033_v34 }
 0x198   :  { %v1238_v59 = vadd.f32 %v1237_v21, %v1141_v17  ;;  %v2341_v62 = vpop.f32.mrb[44].mxu0  ;;  %2486 = vmatprep.subr.bf16.mxu1 %v3037_v37  ;;  %v1285_v58 = vmax.f32 %v1235_v55, 0.0 }
 0x199   :  { %v2342_v23 = vpop.f32.mrb[45].mxu0 }
 0x19a   :  { %v1286_v1 = vmax.f32 %v1238_v59, 0.0  ;;  %v2343_v4 = vadd.f32 %v2342_v23, %v2341_v62  ;;  %v2344_v5 = vpop.f32.mrb[46].mxu0  ;;  %v3112_v6 = vpop.f32.mrb[44].mxu1 }
 0x19b   :  { %v2345_v26 = vpop.f32.mrb[47].mxu0  ;;  %2494 = vmatpush3.bf16.msra.mxu1 %v3044_v43  ;;  %v1266_v8 = vpop.f32.mrb[45].mxu1 }
 0x19c   :  { %v1299_v61 = vpack.c.bf16 %v1286_v1, %v1285_v58  ;;  %v1146_v2 = vadd.f32 %v2343_v4, %v3068_v13  ;;  %v2346_v7 = vadd.f32 %v2345_v26, %v2344_v5  ;;  %2487 = vmatprep.subr.bf16.mxu1 %v3047_v46  ;;  %v3117_v34 = vpop.f32.mrb[46].mxu1 }
 0x19d   :  { %v1269_v10 = vpop.f32.mrb[47].mxu1 }
 0x19e   :  { %v1243_v37 = vadd.f32 %v2473_v24, %v1146_v2  ;;  %v1149_v9 = vadd.f32 %v2346_v7, %v3070_v19  ;;  %1466 = vmatmul.mubr.bf16.gmra.mrb[56].mxu1 %v1299_v61 }
 0x19f   :  { %1475 = vmatprep.mubr.bf16.mxu1 %v2904_v0  ;;  %2495 = vmatpush3.bf16.msra.mxu1 %v3051_v54 }
 0x1a0   :  { %v1246_v11 = vadd.f32 %v2474_v30, %v1149_v9  ;;  %v2347_v43 = vpop.f32.mrb[48].mxu0  ;;  %2488 = vmatprep.subr.bf16.mxu1 %v3055_v57  ;;  %v1287_v12 = vmax.f32 %v1243_v37, 0.0  ;;  %v2684_v37 = vld [vmem:[#allocation8 + $0x70] sm:$0xff]  }
 0x1a1   :  { %v2348_v13 = vpop.f32.mrb[49].mxu0  ;;  %v2685_v9 = vld [vmem:[#allocation8 + $0x30] sm:$0xff]   ;;  %2399 = vmatprep.subr.bf16.mxu0 %v2684_v37 }
 0x1a2   :  { %v1288_v14 = vmax.f32 %v1246_v11, 0.0  ;;  %v2349_v15 = vadd.f32 %v2348_v13, %v2347_v43  ;;  %v2350_v46 = vpop.f32.mrb[50].mxu0  ;;  %2400 = vmatpush3.bf16.msra.mxu0 %v2685_v9 }
 0x1a3   :  { %v2351_v20 = vpop.f32.mrb[51].mxu0  ;;  %2496 = vmatpush3.bf16.msra.mxu1 %v3062_v63 }
 0x1a4   :  { %v2352_v24 = vadd.f32 %v2351_v20, %v2350_v46  ;;  %v1154_v19 = vadd.f32 %v2349_v15, %v3074_v36  ;;  %v1300_v25 = vpack.c.bf16 %v1288_v14, %v1287_v12  ;;  %2489 = vmatprep.subr.bf16.mxu1 %v2684_v37 }
 0x1a6   :  { %v1251_v28 = vadd.f32 %v1250_v53, %v1154_v19  ;;  %v1157_v29 = vadd.f32 %v2352_v24, %v3076_v42  ;;  %1476 = vmatmul.mubr.bf16.gmra.mrb[60].mxu1 %v1300_v25 }
 0x1a7   :  { %1485 = vmatprep.mubr.bf16.mxu1 %v2904_v0  ;;  %2497 = vmatpush3.bf16.msra.mxu1 %v2685_v9 }
 0x1a8   :  { %v1254_v54 = vadd.f32 %v1253_v56, %v1157_v29  ;;  %v2353_v57 = vpop.f32.mrb[52].mxu0  ;;  %v1289_v30 = vmax.f32 %v1251_v28, 0.0 }
 0x1a9   :  { %v2354_v18 = vpop.f32.mrb[53].mxu0 }
 0x1aa   :  { %v1290_v31 = vmax.f32 %v1254_v54, 0.0  ;;  %v2355_v32 = vadd.f32 %v2354_v18, %v2353_v57  ;;  %v2356_v21 = vpop.f32.mrb[54].mxu0 }
 0x1ab   :  { %v2357_v33 = vpop.f32.mrb[55].mxu0 }
 0x1ac   :  { %v1301_v35 = vpack.c.bf16 %v1290_v31, %v1289_v30  ;;  %v1162_v63 = vadd.f32 %v2355_v32, %v3080_v60  ;;  %v2358_v39 = vadd.f32 %v2357_v33, %v2356_v21 }
 0x1ae   :  { %v1259_v36 = vadd.f32 %v3103_v49, %v1162_v63  ;;  %v1165_v40 = vadd.f32 %v2358_v39, %v3082_v3  ;;  %1486 = vmatmul.mubr.bf16.gmra.mrb[64].mxu1 %v1301_v35 }
 0x1af   :  { %1495 = vmatprep.mubr.bf16.mxu1 %v2904_v0 }
 0x1b0   :  { %v1262_v42 = vadd.f32 %v2478_v16, %v1165_v40  ;;  %v2359_v44 = vpop.f32.mrb[56].mxu0  ;;  %v1291_v45 = vmax.f32 %v1259_v36, 0.0 }
 0x1b1   :  { %v2360_v38 = vpop.f32.mrb[57].mxu0 }
 0x1b2   :  { %v1292_v47 = vmax.f32 %v1262_v42, 0.0  ;;  %v2361_v41 = vadd.f32 %v2360_v38, %v2359_v44  ;;  %v2362_v50 = vpop.f32.mrb[58].mxu0 }
 0x1b3   :  { %v2363_v52 = vpop.f32.mrb[59].mxu0 }
 0x1b4   :  { %v2364_v53 = vadd.f32 %v2363_v52, %v2362_v50  ;;  %v1170_v55 = vadd.f32 %v2361_v41, %v3086_v22  ;;  %v1302_v60 = vpack.c.bf16 %v1292_v47, %v1291_v45 }
 0x1b6   :  { %v1267_v17 = vadd.f32 %v1266_v8, %v1170_v55  ;;  %v1173_v49 = vadd.f32 %v2364_v53, %v3088_v27  ;;  %1496 = vmatmul.mubr.bf16.gmra.mrb[68].mxu1 %v1302_v60 }
 0x1b7   :  { %1505 = vmatprep.mubr.bf16.mxu1 %v2904_v0 }
 0x1b8   :  { %v1270_v3 = vadd.f32 %v1269_v10, %v1173_v49  ;;  %v2365_v56 = vpop.f32.mrb[60].mxu0  ;;  %v1293_v59 = vmax.f32 %v1267_v17, 0.0  ;;  %v2687_v10 = vld [vmem:[#allocation8 + $0x38] sm:$0xff]  }
 0x1b9   :  { %v2366_v16 = vpop.f32.mrb[61].mxu0 }
 0x1ba   :  { %v1294_v62 = vmax.f32 %v1270_v3, 0.0  ;;  %v2367_v23 = vadd.f32 %v2366_v16, %v2365_v56  ;;  %v2368_v58 = vpop.f32.mrb[62].mxu0 }
 0x1bb   :  { %v2369_v1 = vpop.f32.mrb[63].mxu0 }
 0x1bc   :  { %v1303_v4 = vpack.c.bf16 %v1294_v62, %v1293_v59  ;;  %v1178_v5 = vadd.f32 %v2367_v23, %v3092_v48  ;;  %v2370_v26 = vadd.f32 %v2369_v1, %v2368_v58  ;;  %v2686_v48 = vld [vmem:[#allocation8 + $0x78] sm:$0xff]  }
 0x1bd   :  { %2401 = vmatprep.subr.bf16.mxu0 %v2686_v48  ;;  %2490 = vmatprep.subr.bf16.mxu1 %v2686_v48 }
 0x1be   :  { %v1275_v22 = vadd.f32 %v3112_v6, %v1178_v5  ;;  %v1181_v61 = vadd.f32 %v2370_v26, %v3094_v51  ;;  %1506 = vmatmul.mubr.bf16.gmra.mrb[72].mxu1 %v1303_v4  ;;  %2402 = vmatpush3.bf16.msra.mxu0 %v2687_v10  ;;  %v1323_v51 = vlaneseq }
 0x1bf   :  { %1515 = vmatprep.mubr.bf16.mxu1 %v2904_v0  ;;  %2498 = vmatpush3.bf16.msra.mxu1 %v2687_v10 }
 0x1c0   :  { %v1278_v27 = vadd.f32 %v3117_v34, %v1181_v61  ;;  %v1295_v2 = vmax.f32 %v1275_v22, 0.0  ;;  %v1324_v0 = vshrl.u32 %v1323_v51, 7  ;;  %v1321_v34 = vld [vmem:[%s3377_s4] sm:$0x3] }
 0x1c2   :  { %v1296_v7 = vmax.f32 %v1278_v27, 0.0  ;;  %v1325_v6 = vsub.s32 0, %v1324_v0  ;;  %v1329_v11 = vsub.s32 1, %v1324_v0 }
 0x1c4   :  { %v1304_v8 = vpack.c.bf16 %v1296_v7, %v1295_v2  ;;  %v3142_v43 = vrot.slane %v1321_v34, %v1325_v6  ;;  %v3144_v13 = vrot.slane %v1321_v34, %v1329_v11 }
 0x1c6   :  { %1516 = vmatmul.mubr.bf16.gmra.mrb[76].mxu1 %v1304_v8 }
 0x261   :  { %v1447_v12 = vpop.f32.mrb[48].mxu1 }
 0x262   :  { %v1448_v14 = vadd.f32 %v1447_v12, %v3142_v43  ;;  %v1449_v15 = vpop.f32.mrb[49].mxu1 }
 0x263   :  { %v1450_v46 = vadd.f32 %v1449_v15, %v3144_v13  ;;  %v1451_v20 = vpop.f32.mrb[50].mxu1 }
 0x264   :  { %v1452_v24 = vadd.f32 %v1451_v20, %v3142_v43  ;;  %v1453_v19 = vpop.f32.mrb[51].mxu1  ;;  %v1526_v28 = vmax.f32 %v1448_v14, 0.0 }
 0x265   :  { %v1454_v25 = vadd.f32 %v1453_v19, %v3144_v13  ;;  %v1527_v54 = vmax.f32 %v1450_v46, 0.0 }
 0x266   :  { %v1528_v29 = vmax.f32 %v1452_v24, 0.0 }
 0x267   :  { %v1529_v57 = vmax.f32 %v1454_v25, 0.0 }
 0x268   :  { %v1558_v18 = vpack.c.bf16 %v1528_v29, %v1526_v28 }
 0x269   :  { %v1559_v30 = vpack.c.bf16 %v1529_v57, %v1527_v54  ;;  %v1457_v31 = vpop.f32.mrb[52].mxu1 }
 0x26a   :  { %v1458_v32 = vadd.f32 %v1457_v31, %v3142_v43  ;;  %v1459_v21 = vpop.f32.mrb[53].mxu1 }
 0x26b   :  { %v1460_v33 = vadd.f32 %v1459_v21, %v3144_v13  ;;  %v1461_v35 = vpop.f32.mrb[54].mxu1  ;;  %1741 = vmatprep.mubr.bf16.mxu0 %v1559_v30 }
 0x26c   :  { %v1462_v63 = vadd.f32 %v1461_v35, %v3142_v43  ;;  %v1463_v39 = vpop.f32.mrb[55].mxu1  ;;  %1742 = vmatmul.mubr.bf16.vlgmr.msra.gmra.mrb[64].mxu0 %v1558_v18  ;;  %v1530_v40 = vmax.f32 %v1458_v32, 0.0 }
 0x26d   :  { %v1464_v36 = vadd.f32 %v1463_v39, %v3144_v13  ;;  %v1531_v44 = vmax.f32 %v1460_v33, 0.0 }
 0x26e   :  { %v1532_v42 = vmax.f32 %v1462_v63, 0.0 }
 0x26f   :  { %v1533_v38 = vmax.f32 %v1464_v36, 0.0 }
 0x270   :  { %v1560_v45 = vpack.c.bf16 %v1532_v42, %v1530_v40 }
 0x271   :  { %v1561_v47 = vpack.c.bf16 %v1533_v38, %v1531_v44  ;;  %v1467_v41 = vpop.f32.mrb[56].mxu1 }
 0x272   :  { %v1468_v50 = vadd.f32 %v1467_v41, %v3142_v43  ;;  %v1469_v52 = vpop.f32.mrb[57].mxu1 }
 0x273   :  { %v1470_v53 = vadd.f32 %v1469_v52, %v3144_v13  ;;  %v1471_v55 = vpop.f32.mrb[58].mxu1  ;;  %1749 = vmatprep.mubr.bf16.mxu0 %v1561_v47 }
 0x274   :  { %v1472_v60 = vadd.f32 %v1471_v55, %v3142_v43  ;;  %v1473_v17 = vpop.f32.mrb[59].mxu1  ;;  %1750 = vmatmul.mubr.bf16.gmra.mrb[68].mxu0 %v1560_v45  ;;  %v1534_v3 = vmax.f32 %v1468_v50, 0.0 }
 0x275   :  { %v1474_v49 = vadd.f32 %v1473_v17, %v3144_v13  ;;  %v1535_v16 = vmax.f32 %v1470_v53, 0.0 }
 0x276   :  { %v1536_v56 = vmax.f32 %v1472_v60, 0.0 }
 0x277   :  { %v1537_v59 = vmax.f32 %v1474_v49, 0.0 }
 0x278   :  { %v1562_v62 = vpack.c.bf16 %v1536_v56, %v1534_v3 }
 0x279   :  { %v1563_v23 = vpack.c.bf16 %v1537_v59, %v1535_v16  ;;  %v1477_v58 = vpop.f32.mrb[60].mxu1 }
 0x27a   :  { %v1478_v1 = vadd.f32 %v1477_v58, %v3142_v43  ;;  %v1479_v4 = vpop.f32.mrb[61].mxu1 }
 0x27b   :  { %v1480_v5 = vadd.f32 %v1479_v4, %v3144_v13  ;;  %v1481_v26 = vpop.f32.mrb[62].mxu1  ;;  %1757 = vmatprep.mubr.bf16.mxu0 %v1563_v23 }
 0x27c   :  { %v1482_v22 = vadd.f32 %v1481_v26, %v3142_v43  ;;  %v1483_v61 = vpop.f32.mrb[63].mxu1  ;;  %1758 = vmatmul.mubr.bf16.gmra.mrb[72].mxu0 %v1562_v62  ;;  %v1538_v2 = vmax.f32 %v1478_v1, 0.0 }
 0x27d   :  { %v1484_v27 = vadd.f32 %v1483_v61, %v3144_v13  ;;  %v1539_v8 = vmax.f32 %v1480_v5, 0.0 }
 0x27e   :  { %v1540_v7 = vmax.f32 %v1482_v22, 0.0 }
 0x27f   :  { %v1541_v37 = vmax.f32 %v1484_v27, 0.0 }
 0x280   :  { %v1564_v9 = vpack.c.bf16 %v1540_v7, %v1538_v2  ;;  %v3181_v7 = vld [vmem:[%s3379_s6] ss:$0 sm:$0xff]  ;;  %s2905_s6 = smov [#allocation10]  }
 0x281   :  { %v1565_v48 = vpack.c.bf16 %v1541_v37, %v1539_v8  ;;  %v1487_v10 = vpop.f32.mrb[64].mxu1  ;;  %s2003_s14 = sshll.u32 %s2905_s6, 4  ;;  %s2004_s14 = int_to_ptr.vmem [resolvable:$true] %s2003_s14 }
 0x282   :  { %v1488_v51 = vadd.f32 %v1487_v10, %v3142_v43  ;;  %v1489_v0 = vpop.f32.mrb[65].mxu1  ;;  %s2840_s17 = scalar_lea.vmem %s2004_s14, 2048  ;;  %p2845_p5 = scmp.lt.s32.totalorder %s2004_s14, %s2004_s14 }
 0x283   :  { %v1490_v6 = vadd.f32 %v1489_v0, %v3144_v13  ;;  %v1491_v34 = vpop.f32.mrb[66].mxu1  ;;  %1765 = vmatprep.mubr.bf16.mxu0 %v1565_v48  ;;  %p2841_p4 = scmp.ne.s32.totalorder %s2004_s14, %s2840_s17  ;;  %p2846_p6 = scmp.lt.s32.totalorder %s2840_s17, %s2840_s17 }
 0x284   :  { %v1492_v11 = vadd.f32 %v1491_v34, %v3142_v43  ;;  %v1493_v12 = vpop.f32.mrb[67].mxu1  ;;  %1766 = vmatmul.mubr.bf16.gmra.mrb[76].mxu0 %v1564_v9  ;;  %v1542_v15 = vmax.f32 %v1488_v51, 0.0 }
 0x285   :  { %v1494_v14 = vadd.f32 %v1493_v12, %v3144_v13  ;;  %v1543_v20 = vmax.f32 %v1490_v6, 0.0  ;;  %p2847_p7 = por %p2846_p6, %p2845_p5 }
 0x286   :  { %v1544_v46 = vmax.f32 %v1492_v11, 0.0 }
 0x287   :  { %v1545_v24 = vmax.f32 %v1494_v14, 0.0  ;;  %p2848_p8 = pnand %p2847_p7, %p2841_p4 }
 0x288   :  { %v1566_v19 = vpack.c.bf16 %v1544_v46, %v1542_v15 }
 0x289   :  { %v1567_v25 = vpack.c.bf16 %v1545_v24, %v1543_v20  ;;  %v1497_v28 = vpop.f32.mrb[68].mxu1 }
 0x28a   :  { %v1498_v29 = vadd.f32 %v1497_v28, %v3142_v43  ;;  %v1499_v54 = vpop.f32.mrb[69].mxu1 }
 0x28b   :  { %v1500_v57 = vadd.f32 %v1499_v54, %v3144_v13  ;;  %v1501_v18 = vpop.f32.mrb[70].mxu1  ;;  %1773 = vmatprep.mubr.bf16.mxu0 %v1567_v25 }
 0x28c   :  { %v1502_v30 = vadd.f32 %v1501_v18, %v3142_v43  ;;  %v1503_v31 = vpop.f32.mrb[71].mxu1  ;;  %1774 = vmatmul.mubr.bf16.gmra.mrb[80].mxu0 %v1566_v19  ;;  %v1546_v21 = vmax.f32 %v1498_v29, 0.0 }
 0x28d   :  { %v1504_v32 = vadd.f32 %v1503_v31, %v3144_v13  ;;  %v1547_v35 = vmax.f32 %v1500_v57, 0.0 }
 0x28e   :  { %v1548_v33 = vmax.f32 %v1502_v30, 0.0 }
 0x28f   :  { %v1549_v63 = vmax.f32 %v1504_v32, 0.0 }
 0x290   :  { %v1568_v39 = vpack.c.bf16 %v1548_v33, %v1546_v21 }
 0x291   :  { %v1569_v36 = vpack.c.bf16 %v1549_v63, %v1547_v35  ;;  %v1507_v40 = vpop.f32.mrb[72].mxu1 }
 0x292   :  { %v1508_v42 = vadd.f32 %v1507_v40, %v3142_v43  ;;  %v1509_v44 = vpop.f32.mrb[73].mxu1 }
 0x293   :  { %v1510_v38 = vadd.f32 %v1509_v44, %v3144_v13  ;;  %v1511_v45 = vpop.f32.mrb[74].mxu1  ;;  %1781 = vmatprep.mubr.bf16.mxu0 %v1569_v36 }
 0x294   :  { %v1512_v47 = vadd.f32 %v1511_v45, %v3142_v43  ;;  %v1513_v41 = vpop.f32.mrb[75].mxu1  ;;  %1782 = vmatmul.mubr.bf16.gmra.mrb[84].mxu0 %v1568_v39  ;;  %v1550_v52 = vmax.f32 %v1508_v42, 0.0 }
 0x295   :  { %v1514_v50 = vadd.f32 %v1513_v41, %v3144_v13  ;;  %v1551_v55 = vmax.f32 %v1510_v38, 0.0 }
 0x296   :  { %v1552_v53 = vmax.f32 %v1512_v47, 0.0 }
 0x297   :  { %v1553_v60 = vmax.f32 %v1514_v50, 0.0 }
 0x298   :  { %v1570_v17 = vpack.c.bf16 %v1552_v53, %v1550_v52 }
 0x299   :  { %v1571_v49 = vpack.c.bf16 %v1553_v60, %v1551_v55  ;;  %v1517_v3 = vpop.f32.mrb[76].mxu1 }
 0x29a   :  { %v1518_v56 = vadd.f32 %v1517_v3, %v3142_v43  ;;  %v1519_v16 = vpop.f32.mrb[77].mxu1 }
 0x29b   :  { %v1520_v59 = vadd.f32 %v1519_v16, %v3144_v13  ;;  %v1521_v62 = vpop.f32.mrb[78].mxu1  ;;  %1789 = vmatprep.mubr.bf16.mxu1 %v1571_v49 }
 0x29c   :  { %v1522_v23 = vadd.f32 %v1521_v62, %v3142_v43  ;;  %v1523_v58 = vpop.f32.mrb[79].mxu1  ;;  %1790 = vmatmul.mubr.bf16.vlgmr.msra.gmra.mrb[80].mxu1 %v1570_v17  ;;  %v1554_v4 = vmax.f32 %v1518_v56, 0.0 }
 0x29d   :  { %v1524_v1 = vadd.f32 %v1523_v58, %v3144_v13  ;;  %v1555_v26 = vmax.f32 %v1520_v59, 0.0 }
 0x29e   :  { %v1556_v5 = vmax.f32 %v1522_v23, 0.0 }
 0x29f   :  { %v1557_v22 = vmax.f32 %v1524_v1, 0.0 }
 0x2a0   :  { %v1572_v61 = vpack.c.bf16 %v1556_v5, %v1554_v4 }
 0x2a1   :  { %v1573_v27 = vpack.c.bf16 %v1557_v22, %v1555_v26 }
 0x2a3   :  { %1797 = vmatprep.mubr.bf16.mxu1 %v1573_v27 }
 0x2a4   :  { %1798 = vmatmul.mubr.bf16.gmra.mrb[84].mxu1 %v1572_v61 }
 0x33f   :  { %v2403_v2 = vpop.f32.mrb[64].mxu0 }
 0x340   :  { %v2404_v8 = vpop.f32.mrb[65].mxu0 }
 0x341   :  { %v2405_v43 = vadd.f32 %v2404_v8, %v2403_v2  ;;  %v2406_v37 = vpop.f32.mrb[66].mxu0 }
 0x342   :  { %v2407_v9 = vpop.f32.mrb[67].mxu0 }
 0x343   :  { %v3184_v13 = vadd.f32 %v2405_v43, %v3181_v7  ;;  %v2408_v48 = vadd.f32 %v2407_v9, %v2406_v37 }
 0x345   :  { %1806 = vst [vmem:[#allocation10] sm:$0xff] %v3184_v13  ;;  %v3188_v10 = vadd.f32 %v2408_v48, %v3181_v7  ;;  %1822 = vmax.xlane.f32.xlu0 %v3184_v13 }
 0x347   :  { %1807 = vst [vmem:[#allocation10 + $0x8] sm:$0xff] %v3188_v10  ;;  %v2409_v51 = vpop.f32.mrb[68].mxu0 }
 0x348   :  { %v2410_v0 = vpop.f32.mrb[69].mxu0 }
 0x349   :  { %v2411_v6 = vadd.f32 %v2410_v0, %v2409_v51  ;;  %v2412_v34 = vpop.f32.mrb[70].mxu0  ;;  %1824 = vmax.xlane.f32.xlu0 %v3188_v10 }
 0x34a   :  { %v2413_v11 = vpop.f32.mrb[71].mxu0 }
 0x34b   :  { %v3194_v12 = vadd.f32 %v2411_v6, %v3181_v7  ;;  %v2414_v14 = vadd.f32 %v2413_v11, %v2412_v34 }
 0x34d   :  { %1808 = vst [vmem:[#allocation10 + $0x10] sm:$0xff] %v3194_v12  ;;  %v3198_v15 = vadd.f32 %v2414_v14, %v3181_v7  ;;  %1826 = vmax.xlane.f32.xlu1 %v3194_v12 }
 0x34f   :  { %1809 = vst [vmem:[#allocation10 + $0x18] sm:$0xff] %v3198_v15  ;;  %v2415_v46 = vpop.f32.mrb[72].mxu0 }
 0x350   :  { %v2416_v20 = vpop.f32.mrb[73].mxu0 }
 0x351   :  { %v2417_v24 = vadd.f32 %v2416_v20, %v2415_v46  ;;  %v2418_v19 = vpop.f32.mrb[74].mxu0  ;;  %1828 = vmax.xlane.f32.xlu1 %v3198_v15 }
 0x352   :  { %v2419_v25 = vpop.f32.mrb[75].mxu0 }
 0x353   :  { %v3204_v28 = vadd.f32 %v2417_v24, %v3181_v7  ;;  %v2420_v29 = vadd.f32 %v2419_v25, %v2418_v19 }
 0x355   :  { %1810 = vst [vmem:[#allocation10 + $0x20] sm:$0xff] %v3204_v28  ;;  %v3208_v54 = vadd.f32 %v2420_v29, %v3181_v7  ;;  %1830 = vmax.xlane.f32.xlu0 %v3204_v28 }
 0x357   :  { %1811 = vst [vmem:[#allocation10 + $0x28] sm:$0xff] %v3208_v54  ;;  %v2421_v57 = vpop.f32.mrb[76].mxu0  ;;  %1832 = vmax.xlane.f32.xlu1 %v3208_v54 }
 0x358   :  { %v2422_v18 = vpop.f32.mrb[77].mxu0 }
 0x359   :  { %v2423_v30 = vadd.f32 %v2422_v18, %v2421_v57  ;;  %v2424_v31 = vpop.f32.mrb[78].mxu0 }
 0x35a   :  { %v2425_v32 = vpop.f32.mrb[79].mxu0 }
 0x35b   :  { %v3214_v21 = vadd.f32 %v2423_v30, %v3181_v7  ;;  %v2426_v33 = vadd.f32 %v2425_v32, %v2424_v31 }
 0x35d   :  { %1812 = vst [vmem:[#allocation10 + $0x30] sm:$0xff] %v3214_v21  ;;  %v3218_v35 = vadd.f32 %v2426_v33, %v3181_v7  ;;  %1834 = vmax.xlane.f32.xlu0 %v3214_v21 }
 0x35f   :  { %1813 = vst [vmem:[#allocation10 + $0x38] sm:$0xff] %v3218_v35  ;;  %v2427_v63 = vpop.f32.mrb[80].mxu0  ;;  %1836 = vmax.xlane.f32.xlu1 %v3218_v35 }
 0x360   :  { %v2428_v39 = vpop.f32.mrb[81].mxu0 }
 0x361   :  { %v2429_v36 = vadd.f32 %v2428_v39, %v2427_v63  ;;  %v2430_v40 = vpop.f32.mrb[82].mxu0 }
 0x362   :  { %v2431_v42 = vpop.f32.mrb[83].mxu0 }
 0x363   :  { %v3224_v44 = vadd.f32 %v2429_v36, %v3181_v7  ;;  %v2432_v38 = vadd.f32 %v2431_v42, %v2430_v40 }
 0x365   :  { %1814 = vst [vmem:[#allocation10 + $0x40] sm:$0xff] %v3224_v44  ;;  %v3228_v45 = vadd.f32 %v2432_v38, %v3181_v7  ;;  %1838 = vmax.xlane.f32.xlu0 %v3224_v44 }
 0x367   :  { %1815 = vst [vmem:[#allocation10 + $0x48] sm:$0xff] %v3228_v45  ;;  %v2433_v47 = vpop.f32.mrb[84].mxu0  ;;  %1840 = vmax.xlane.f32.xlu1 %v3228_v45 }
 0x368   :  { %v2434_v41 = vpop.f32.mrb[85].mxu0 }
 0x369   :  { %v2435_v50 = vadd.f32 %v2434_v41, %v2433_v47  ;;  %v2436_v52 = vpop.f32.mrb[86].mxu0 }
 0x36a   :  { %v2437_v53 = vpop.f32.mrb[87].mxu0 }
 0x36b   :  { %v3234_v55 = vadd.f32 %v2435_v50, %v3181_v7  ;;  %v2438_v60 = vadd.f32 %v2437_v53, %v2436_v52 }
 0x36d   :  { %1816 = vst [vmem:[#allocation10 + $0x50] sm:$0xff] %v3234_v55  ;;  %v3238_v17 = vadd.f32 %v2438_v60, %v3181_v7  ;;  %1842 = vmax.xlane.f32.xlu0 %v3234_v55 }
 0x36f   :  { %1817 = vst [vmem:[#allocation10 + $0x58] sm:$0xff] %v3238_v17  ;;  %v2439_v49 = vpop.f32.mrb[80].mxu1  ;;  %1844 = vmax.xlane.f32.xlu1 %v3238_v17 }
 0x370   :  { %v2440_v3 = vpop.f32.mrb[81].mxu1 }
 0x371   :  { %v2441_v56 = vadd.f32 %v2440_v3, %v2439_v49  ;;  %v2442_v16 = vpop.f32.mrb[82].mxu1 }
 0x372   :  { %v2443_v59 = vpop.f32.mrb[83].mxu1 }
 0x373   :  { %v3244_v62 = vadd.f32 %v2441_v56, %v3181_v7  ;;  %v2444_v23 = vadd.f32 %v2443_v59, %v2442_v16 }
 0x375   :  { %1818 = vst [vmem:[#allocation10 + $0x60] sm:$0xff] %v3244_v62  ;;  %v3248_v58 = vadd.f32 %v2444_v23, %v3181_v7  ;;  %1846 = vmax.xlane.f32.xlu0 %v3244_v62 }
 0x377   :  { %1819 = vst [vmem:[#allocation10 + $0x68] sm:$0xff] %v3248_v58  ;;  %v2445_v1 = vpop.f32.mrb[84].mxu1  ;;  %1848 = vmax.xlane.f32.xlu1 %v3248_v58 }
 0x378   :  { %v2446_v4 = vpop.f32.mrb[85].mxu1 }
 0x379   :  { %v2447_v5 = vadd.f32 %v2446_v4, %v2445_v1  ;;  %v2448_v26 = vpop.f32.mrb[86].mxu1 }
 0x37a   :  { %v2449_v22 = vpop.f32.mrb[87].mxu1 }
 0x37b   :  { %v3254_v61 = vadd.f32 %v2447_v5, %v3181_v7  ;;  %v2450_v27 = vadd.f32 %v2449_v22, %v2448_v26 }
 0x37d   :  { %1820 = vst [vmem:[#allocation10 + $0x70] sm:$0xff] %v3254_v61  ;;  %v3258_v2 = vadd.f32 %v2450_v27, %v3181_v7  ;;  %1850 = vmax.xlane.f32.xlu0 %v3254_v61 }
 0x37f   :  { %1821 = vst [vmem:[#allocation10 + $0x78] sm:$0xff] %v3258_v2  ;;  %1852 = vmax.xlane.f32.xlu1 %v3258_v2 }
 0x3d2   :  { %v1823_v8 = vpop.xlane.xlu0 %1822 }
 0x3d3   :  { %v3264_v43 = vsub.f32 %v3184_v13, %v1823_v8 }
 0x3d5   :  { %v1870_v37 = vmul.f32 1.442695, %v3264_v43 }
 0x3d6   :  { %v1825_v9 = vpop.xlane.xlu0 %1824 }
 0x3d7   :  { %2688 = vpow2.f32 %v1870_v37  ;;  %v3268_v48 = vsub.f32 %v3188_v10, %v1825_v9 }
 0x3d9   :  { %v1872_v7 = vmul.f32 1.442695, %v3268_v48 }
 0x3da   :  { %v1827_v51 = vpop.xlane.xlu1 %1826 }
 0x3db   :  { %2690 = vpow2.f32 %v1872_v7  ;;  %v3272_v0 = vsub.f32 %v3194_v12, %v1827_v51 }
 0x3dd   :  { %v1874_v6 = vmul.f32 1.442695, %v3272_v0 }
 0x3de   :  { %v1829_v34 = vpop.xlane.xlu1 %1828 }
 0x3df   :  { %2692 = vpow2.f32 %v1874_v6  ;;  %v3276_v13 = vsub.f32 %v3198_v15, %v1829_v34 }
 0x3e1   :  { %v2689_v11 = vpop.eup %2688  ;;  %v1876_v14 = vmul.f32 1.442695, %v3276_v13 }
 0x3e2   :  { %1902 = vadd.xlane.f32.xlu0 %v2689_v11  ;;  %v1831_v10 = vpop.xlane.xlu0 %1830 }
 0x3e3   :  { %2694 = vpow2.f32 %v1876_v14  ;;  %v3280_v46 = vsub.f32 %v3204_v28, %v1831_v10 }
 0x3e4   :  { %v1833_v20 = vpop.xlane.xlu1 %1832 }
 0x3e5   :  { %v2691_v24 = vpop.eup %2690  ;;  %v1878_v12 = vmul.f32 1.442695, %v3280_v46  ;;  %v3284_v19 = vsub.f32 %v3208_v54, %v1833_v20 }
 0x3e6   :  { %1904 = vadd.xlane.f32.xlu1 %v2691_v24 }
 0x3e7   :  { %2696 = vpow2.f32 %v1878_v12  ;;  %v1880_v15 = vmul.f32 1.442695, %v3284_v19 }
 0x3e9   :  { %v2693_v25 = vpop.eup %2692  ;;  %2698 = vpow2.f32 %v1880_v15 }
 0x3ea   :  { %1906 = vadd.xlane.f32.xlu0 %v2693_v25  ;;  %v1835_v29 = vpop.xlane.xlu0 %1834 }
 0x3eb   :  { %v3288_v57 = vsub.f32 %v3214_v21, %v1835_v29 }
 0x3ec   :  { %v1837_v28 = vpop.xlane.xlu1 %1836 }
 0x3ed   :  { %v2695_v18 = vpop.eup %2694  ;;  %v1882_v30 = vmul.f32 1.442695, %v3288_v57  ;;  %v3292_v31 = vsub.f32 %v3218_v35, %v1837_v28 }
 0x3ee   :  { %1908 = vadd.xlane.f32.xlu1 %v2695_v18 }
 0x3ef   :  { %2700 = vpow2.f32 %v1882_v30  ;;  %v1884_v54 = vmul.f32 1.442695, %v3292_v31 }
 0x3f1   :  { %v2697_v32 = vpop.eup %2696  ;;  %2702 = vpow2.f32 %v1884_v54 }
 0x3f2   :  { %1910 = vadd.xlane.f32.xlu0 %v2697_v32  ;;  %v1839_v33 = vpop.xlane.xlu0 %1838 }
 0x3f3   :  { %v2699_v63 = vpop.eup %2698  ;;  %v3296_v39 = vsub.f32 %v3224_v44, %v1839_v33 }
 0x3f4   :  { %v1841_v21 = vpop.xlane.xlu1 %1840  ;;  %1912 = vadd.xlane.f32.xlu1 %v2699_v63 }
 0x3f5   :  { %v1886_v36 = vmul.f32 1.442695, %v3296_v39  ;;  %v3300_v40 = vsub.f32 %v3228_v45, %v1841_v21 }
 0x3f7   :  { %2704 = vpow2.f32 %v1886_v36  ;;  %v1888_v35 = vmul.f32 1.442695, %v3300_v40 }
 0x3f9   :  { %v2701_v42 = vpop.eup %2700  ;;  %2706 = vpow2.f32 %v1888_v35 }
 0x3fa   :  { %1914 = vadd.xlane.f32.xlu0 %v2701_v42  ;;  %v1843_v38 = vpop.xlane.xlu0 %1842 }
 0x3fb   :  { %v2703_v47 = vpop.eup %2702  ;;  %v3304_v41 = vsub.f32 %v3234_v55, %v1843_v38 }
 0x3fc   :  { %v1845_v44 = vpop.xlane.xlu1 %1844  ;;  %1916 = vadd.xlane.f32.xlu1 %v2703_v47 }
 0x3fd   :  { %v1890_v50 = vmul.f32 1.442695, %v3304_v41  ;;  %v3308_v52 = vsub.f32 %v3238_v17, %v1845_v44 }
 0x3ff   :  { %2708 = vpow2.f32 %v1890_v50  ;;  %v1892_v45 = vmul.f32 1.442695, %v3308_v52 }
 0x401   :  { %v2705_v53 = vpop.eup %2704  ;;  %2710 = vpow2.f32 %v1892_v45 }
 0x402   :  { %1918 = vadd.xlane.f32.xlu0 %v2705_v53  ;;  %v1847_v60 = vpop.xlane.xlu0 %1846 }
 0x403   :  { %v2707_v49 = vpop.eup %2706  ;;  %v3312_v3 = vsub.f32 %v3244_v62, %v1847_v60 }
 0x404   :  { %v1849_v55 = vpop.xlane.xlu1 %1848  ;;  %1920 = vadd.xlane.f32.xlu1 %v2707_v49 }
 0x405   :  { %v1894_v56 = vmul.f32 1.442695, %v3312_v3  ;;  %v3316_v16 = vsub.f32 %v3248_v58, %v1849_v55 }
 0x407   :  { %2712 = vpow2.f32 %v1894_v56  ;;  %v1896_v17 = vmul.f32 1.442695, %v3316_v16 }
 0x409   :  { %v2709_v59 = vpop.eup %2708  ;;  %2714 = vpow2.f32 %v1896_v17 }
 0x40a   :  { %1922 = vadd.xlane.f32.xlu0 %v2709_v59  ;;  %v1851_v23 = vpop.xlane.xlu0 %1850 }
 0x40b   :  { %v2711_v1 = vpop.eup %2710  ;;  %v3320_v4 = vsub.f32 %v3254_v61, %v1851_v23 }
 0x40c   :  { %v1853_v62 = vpop.xlane.xlu1 %1852  ;;  %1924 = vadd.xlane.f32.xlu1 %v2711_v1 }
 0x40d   :  { %v1898_v5 = vmul.f32 1.442695, %v3320_v4  ;;  %v3324_v26 = vsub.f32 %v3258_v2, %v1853_v62 }
 0x40f   :  { %2716 = vpow2.f32 %v1898_v5  ;;  %v1900_v58 = vmul.f32 1.442695, %v3324_v26 }
 0x411   :  { %v2713_v22 = vpop.eup %2712  ;;  %2718 = vpow2.f32 %v1900_v58 }
 0x412   :  { %1926 = vadd.xlane.f32.xlu0 %v2713_v22 }
 0x413   :  { %v2715_v27 = vpop.eup %2714 }
 0x414   :  { %1928 = vadd.xlane.f32.xlu1 %v2715_v27 }
 0x419   :  { %v2717_v8 = vpop.eup %2716 }
 0x41a   :  { %1930 = vadd.xlane.f32.xlu0 %v2717_v8 }
 0x41b   :  { %v2719_v37 = vpop.eup %2718 }
 0x41c   :  { %1932 = vadd.xlane.f32.xlu1 %v2719_v37 }
 0x41d   :  { %2851 = shalt.err (!%p2848_p8)
}
 0x41e   :  { %s2852_s21 = scalar_lea.hbm %s3380_s7, 2048 }
 0x41f   :  { %p2853_p9 = scmp.ne.s32.totalorder %s3380_s7, %s2852_s21  ;;  %p2856_p10 = scmp.lt.u32.totalorder %s2852_s21, %s3380_s7 }
 0x421   :  { %p2858_p11 = pnand %p2856_p10, %p2853_p9 }
 0x423   :  { %2861 = shalt.err (!%p2858_p11)
}
 0x424   :  { %2009 = dma.vmem_to_hbm [thread:$0]  %s2004_s14, 2048, %s3380_s7, [#allocation4], %s2901_s0, %s2901_s0, %s2902_s20  }
 0x425   :  { %s2906_s7 = smov [#allocation11]  }
 0x426   :  { %s2015_s29 = sshll.u32 %s2906_s7, 4  ;;  %s2016_s29 = int_to_ptr.vmem [resolvable:$true] %s2015_s29 }
 0x427   :  { %s2862_s1 = scalar_lea.vmem %s2016_s29, 2048  ;;  %p2867_p13 = scmp.lt.s32.totalorder %s2016_s29, %s2016_s29 }
 0x428   :  { %p2863_p12 = scmp.ne.s32.totalorder %s2016_s29, %s2862_s1  ;;  %p2868_p0 = scmp.lt.s32.totalorder %s2862_s1, %s2862_s1 }
 0x42a   :  { %p2869_p1 = por %p2868_p0, %p2867_p13 }
 0x42c   :  { %p2870_p2 = pnand %p2869_p1, %p2863_p12 }
 0x46f   :  { %v1903_v61 = vpop.xlane.xlu0 %1902 }
 0x470   :  { %2720 = vlog2.f32 %v1903_v61 }
 0x473   :  { %v1905_v2 = vpop.xlane.xlu1 %1904 }
 0x474   :  { %2722 = vlog2.f32 %v1905_v2 }
 0x477   :  { %v1907_v9 = vpop.xlane.xlu0 %1906 }
 0x478   :  { %2724 = vlog2.f32 %v1907_v9 }
 0x47a   :  { %v2721_v7 = vpop.eup %2720 }
 0x47b   :  { %v1935_v51 = vmul.f32 0.6931472, %v2721_v7  ;;  %v1909_v6 = vpop.xlane.xlu1 %1908 }
 0x47c   :  { %2726 = vlog2.f32 %v1909_v6 }
 0x47d   :  { %v1966_v34 = vsub.f32 %v3264_v43, %v1935_v51 }
 0x47e   :  { %v2723_v11 = vpop.eup %2722 }
 0x47f   :  { %1982 = vst [vmem:[#allocation11] sm:$0xff] %v1966_v34  ;;  %v1937_v14 = vmul.f32 0.6931472, %v2723_v11  ;;  %v1911_v10 = vpop.xlane.xlu0 %1910 }
 0x480   :  { %2728 = vlog2.f32 %v1911_v10 }
 0x481   :  { %v1967_v20 = vsub.f32 %v3268_v48, %v1937_v14  ;;  %v1913_v24 = vpop.xlane.xlu1 %1912 }
 0x482   :  { %v2725_v12 = vpop.eup %2724  ;;  %2730 = vlog2.f32 %v1913_v24 }
 0x483   :  { %1983 = vst [vmem:[#allocation11 + $0x8] sm:$0xff] %v1967_v20  ;;  %v1939_v15 = vmul.f32 0.6931472, %v2725_v12 }
 0x485   :  { %v1968_v25 = vsub.f32 %v3272_v0, %v1939_v15 }
 0x486   :  { %v2727_v29 = vpop.eup %2726 }
 0x487   :  { %1984 = vst [vmem:[#allocation11 + $0x10] sm:$0xff] %v1968_v25  ;;  %v1941_v28 = vmul.f32 0.6931472, %v2727_v29  ;;  %v1915_v18 = vpop.xlane.xlu0 %1914 }
 0x488   :  { %2732 = vlog2.f32 %v1915_v18 }
 0x489   :  { %v1969_v43 = vsub.f32 %v3276_v13, %v1941_v28  ;;  %v1917_v30 = vpop.xlane.xlu1 %1916 }
 0x48a   :  { %v2729_v54 = vpop.eup %2728  ;;  %2734 = vlog2.f32 %v1917_v30 }
 0x48b   :  { %1985 = vst [vmem:[#allocation11 + $0x18] sm:$0xff] %v1969_v43  ;;  %v1943_v32 = vmul.f32 0.6931472, %v2729_v54 }
 0x48c   :  { %v2731_v48 = vpop.eup %2730 }
 0x48d   :  { %v1970_v33 = vsub.f32 %v3280_v46, %v1943_v32  ;;  %v1945_v63 = vmul.f32 0.6931472, %v2731_v48 }
 0x48f   :  { %1986 = vst [vmem:[#allocation11 + $0x20] sm:$0xff] %v1970_v33  ;;  %v1971_v21 = vsub.f32 %v3284_v19, %v1945_v63  ;;  %v1919_v0 = vpop.xlane.xlu0 %1918 }
 0x490   :  { %2736 = vlog2.f32 %v1919_v0 }
 0x491   :  { %1987 = vst [vmem:[#allocation11 + $0x28] sm:$0xff] %v1971_v21  ;;  %v1921_v36 = vpop.xlane.xlu1 %1920 }
 0x492   :  { %v2733_v35 = vpop.eup %2732  ;;  %2738 = vlog2.f32 %v1921_v36 }
 0x493   :  { %v1947_v42 = vmul.f32 0.6931472, %v2733_v35 }
 0x494   :  { %v2735_v13 = vpop.eup %2734 }
 0x495   :  { %v1972_v38 = vsub.f32 %v3288_v57, %v1947_v42  ;;  %v1949_v47 = vmul.f32 0.6931472, %v2735_v13 }
 0x497   :  { %1988 = vst [vmem:[#allocation11 + $0x30] sm:$0xff] %v1972_v38  ;;  %v1973_v44 = vsub.f32 %v3292_v31, %v1949_v47  ;;  %v1923_v50 = vpop.xlane.xlu0 %1922 }
 0x498   :  { %2740 = vlog2.f32 %v1923_v50 }
 0x499   :  { %1989 = vst [vmem:[#allocation11 + $0x38] sm:$0xff] %v1973_v44  ;;  %v1925_v46 = vpop.xlane.xlu1 %1924 }
 0x49a   :  { %v2737_v45 = vpop.eup %2736  ;;  %2742 = vlog2.f32 %v1925_v46 }
 0x49b   :  { %v1951_v19 = vmul.f32 0.6931472, %v2737_v45 }
 0x49c   :  { %v2739_v53 = vpop.eup %2738 }
 0x49d   :  { %v1974_v60 = vsub.f32 %v3296_v39, %v1951_v19  ;;  %v1953_v49 = vmul.f32 0.6931472, %v2739_v53 }
 0x49f   :  { %1990 = vst [vmem:[#allocation11 + $0x40] sm:$0xff] %v1974_v60  ;;  %v1975_v55 = vsub.f32 %v3300_v40, %v1953_v49  ;;  %v1927_v56 = vpop.xlane.xlu0 %1926 }
 0x4a0   :  { %2744 = vlog2.f32 %v1927_v56 }
 0x4a1   :  { %1991 = vst [vmem:[#allocation11 + $0x48] sm:$0xff] %v1975_v55  ;;  %v1929_v57 = vpop.xlane.xlu1 %1928 }
 0x4a2   :  { %v2741_v17 = vpop.eup %2740  ;;  %2746 = vlog2.f32 %v1929_v57 }
 0x4a3   :  { %v1955_v31 = vmul.f32 0.6931472, %v2741_v17 }
 0x4a4   :  { %v2743_v59 = vpop.eup %2742 }
 0x4a5   :  { %v1976_v23 = vsub.f32 %v3304_v41, %v1955_v31  ;;  %v1957_v1 = vmul.f32 0.6931472, %v2743_v59 }
 0x4a7   :  { %1992 = vst [vmem:[#allocation11 + $0x50] sm:$0xff] %v1976_v23  ;;  %v1977_v62 = vsub.f32 %v3308_v52, %v1957_v1  ;;  %v1931_v5 = vpop.xlane.xlu0 %1930 }
 0x4a8   :  { %2748 = vlog2.f32 %v1931_v5 }
 0x4a9   :  { %1993 = vst [vmem:[#allocation11 + $0x58] sm:$0xff] %v1977_v62  ;;  %v1933_v39 = vpop.xlane.xlu1 %1932 }
 0x4aa   :  { %v2745_v58 = vpop.eup %2744  ;;  %2750 = vlog2.f32 %v1933_v39 }
 0x4ab   :  { %v1959_v40 = vmul.f32 0.6931472, %v2745_v58 }
 0x4ac   :  { %v2747_v22 = vpop.eup %2746 }
 0x4ad   :  { %v1978_v27 = vsub.f32 %v3312_v3, %v1959_v40  ;;  %v1961_v8 = vmul.f32 0.6931472, %v2747_v22 }
 0x4af   :  { %1994 = vst [vmem:[#allocation11 + $0x60] sm:$0xff] %v1978_v27  ;;  %v1979_v37 = vsub.f32 %v3316_v16, %v1961_v8 }
 0x4b1   :  { %1995 = vst [vmem:[#allocation11 + $0x68] sm:$0xff] %v1979_v37 }
 0x4b2   :  { %v2749_v41 = vpop.eup %2748 }
 0x4b3   :  { %v1963_v61 = vmul.f32 0.6931472, %v2749_v41 }
 0x4b4   :  { %v2751_v2 = vpop.eup %2750 }
 0x4b5   :  { %v1980_v52 = vsub.f32 %v3320_v4, %v1963_v61  ;;  %v1965_v9 = vmul.f32 0.6931472, %v2751_v2 }
 0x4b7   :  { %1996 = vst [vmem:[#allocation11 + $0x70] sm:$0xff] %v1980_v52  ;;  %v1981_v7 = vsub.f32 %v3324_v26, %v1965_v9 }
 0x4b9   :  { %1997 = vst [vmem:[#allocation11 + $0x78] sm:$0xff] %v1981_v7 }
 0x4ba   :  { %2873 = shalt.err (!%p2870_p2)
}
 0x4bb   :  { %s2874_s9 = scalar_lea.hbm %s3381_s8, 2048 }
 0x4bc   :  { %p2875_p3 = scmp.ne.s32.totalorder %s3381_s8, %s2874_s9  ;;  %p2878_p4 = scmp.lt.u32.totalorder %s2874_s9, %s3381_s8 }
 0x4be   :  { %p2880_p5 = pnand %p2878_p4, %p2875_p3 }
 0x4c0   :  { %2883 = shalt.err (!%p2880_p5)
}
 0x4c1   :  { %2021 = dma.vmem_to_hbm [thread:$0]  %s2016_s29, 2048, %s3381_s8, [#allocation12], %s2901_s0, %s2901_s0, %s2902_s20  }
 0x4c2   :  { %2890 = dma.done.wait [#allocation4], 2048  }
 0x4c3   :  { %2891 = vsyncadd [#allocation4], 4294965248 }
 0x4c4   :  { %2892 = dma.done.wait [#allocation12], 2048  }
 0x4c5   :  { %2893 = vsyncadd [#allocation12], 4294965248 }
 0x4c6   :  { %2028 = vsyncpa [#allocation3], 1 }
 0x4c7   :  { %2029 = vsyncpa [#allocation6], 1 }
 0x4c8   :  { %2030 = vsyncpa [#allocation9], 1 }
 0x4c9   :  { %2031 = vsyncpa [#allocation4], 1 }
 0x4ca   :  { %2032 = vsyncpa [#allocation12], 1 }

</bundles_post_ra>
